<compile_context>
chip_gen: v7x
topology: tpu7x:2x2x1
jax: 0.10.0
libtpu: 0.0.40
codegen_flags: <defaults>
</compile_context>

<pallas_src>
import jax
import jax.numpy as jnp
from jax.experimental import pallas as pl
from jax.experimental.pallas import tpu as pltpu

C2D_COUT = 16
KSIZE = 3
PAD = 1


# --------------------------- Pallas kernel ----------------------------------

def _fused_forward_kernel(patches_ref, wc_ref, bc_ref, wd_ref, bd_ref,
                          wo_ref, bo_ref, out_ref, flat_ref):
    """Conv(im2col matmul) + bias + ReLU + MaxPool2d(2,2) + flatten + 2 Linears.

    patches_ref: (Cin*9, 4*M) f32, columns ordered (pool_tap, n, ho, wo)
    wc_ref:      (Cout, Cin*9) f32 (torch conv weight reshaped)
    bc_ref:      (Cout, 1) f32
    wd_ref:      (Fin1, F1) bf16   bd_ref: (1, F1) f32
    wo_ref:      (F1, F2) bf16     bo_ref: (1, F2) f32
    out_ref:     (N, F2) f32
    flat_ref:    VMEM scratch (N, Fin1) f32, torch (c, ho, wo) feature order
    """
    n_batch, feat = flat_ref.shape
    cout = wc_ref.shape[0]
    hw = feat // cout            # Ho*Wo
    m = n_batch * hw             # pooled pixels = N*Ho*Wo

    # --- Conv2d as one MXU matmul (lane-dense output: Cout rows, pixels on lanes)
    acts = jnp.dot(wc_ref[...], patches_ref[...],
                   preferred_element_type=jnp.float32)        # (Cout, 4*M)
    acts = jnp.maximum(acts + bc_ref[...], 0.0)                # bias + ReLU

    # --- MaxPool2d(k=2, s=2): max over the 4 pool-tap blocks (128-lane aligned)
    p01 = jnp.maximum(acts[:, 0 * m:1 * m], acts[:, 1 * m:2 * m])
    p23 = jnp.maximum(acts[:, 2 * m:3 * m], acts[:, 3 * m:4 * m])
    pooled = jnp.maximum(p01, p23)                             # (Cout, M), cols (n, ho, wo)

    # --- Flatten: in-VMEM relayout (Cout, N*Ho*Wo) -> (N, Cout*Ho*Wo).
    # Torch flatten order is (c, ho, wo); each (c, n) pair is one contiguous
    # 64-lane segment, so this is 2*Cout static slice copies (no XLU transpose).
    for n in range(n_batch):
        for c in range(cout):
            flat_ref[n:n + 1, c * hw:(c + 1) * hw] = \
                pooled[c:c + 1, n * hw:(n + 1) * hw]

    # TODO(synk): nn.Dropout(p=0.5) after flatten is identity in eval mode;
    #             training mode would need a pltpu.prng_* mask + 1/(1-p) scale.

    # --- Linear(dense) -> Linear(out): bf16 weight stream, f32 accumulation.
    # (bf16 weights give ~1e-2-level relative deviation vs the f32 torch ref;
    #  switch wd/wo back to f32 if bit-level parity is required.)
    flat = flat_ref[...].astype(jnp.bfloat16)
    h = jnp.dot(flat, wd_ref[...],
                preferred_element_type=jnp.float32) + bd_ref[...]      # (N, F1)
    o = jnp.dot(h.astype(jnp.bfloat16), wo_ref[...],
                preferred_element_type=jnp.float32) + bo_ref[...]      # (N, F2)
    out_ref[...] = o


# --------------------------- JAX glue (one tiny fused op) ---------------------

def _extract_patches_t(x):
    """x: (N, Cin, H, W) -> patchesT (Cin*9, 4*N*Ho*Wo).

    Rows ordered (cin, kh, kw) == torch's conv-weight reshape order; columns
    ordered (hi, wi, n, ho, wo) so the 4 pool taps are contiguous 128-column
    blocks inside the kernel.  Conv: k=3, stride=1, pad=1.  Requires even H, W.
    TODO(synk): the stride-2 pool-tap decimation has no robust static-slice
                Mosaic equivalent, so this single fused XLA op stays outside.
    """
    N, Cin, H, W = x.shape
    Ho, Wo = H // 2, W // 2
    xp = jnp.pad(x, ((0, 0), (0, 0), (PAD, PAD), (PAD, PAD)))
    taps = [xp[:, :, kh:kh + H, kw:kw + W]
            for kh in range(KSIZE) for kw in range(KSIZE)]
    p = jnp.stack(taps, axis=2)                          # (N, Cin, 9, H, W)
    p = p.reshape(N, Cin, KSIZE * KSIZE, Ho, 2, Wo, 2)   # split h->(ho,hi), w->(wo,wi)
    p = p.transpose(1, 2, 4, 6, 0, 3, 5)                 # (Cin, 9, hi, wi, N, Ho, Wo)
    return p.reshape(Cin * KSIZE * KSIZE, 4 * N * Ho * Wo)


def first_neuro_net_forward(x, params):
    N, Cin, H, W = x.shape
    assert H % 2 == 0 and W % 2 == 0, "MaxPool2d(2,2) path assumes even H, W"
    Ho, Wo = H // 2, W // 2
    cout = params["w_conv"].shape[0]
    kdim = Cin * KSIZE * KSIZE
    fin1 = cout * Ho * Wo
    f1 = params["w_dense"].shape[1]
    f2 = params["w_out"].shape[1]
    mprime = 4 * N * Ho * Wo

    patches = _extract_patches_t(x)                      # (Cin*9, 4*N*Ho*Wo) f32

    return pl.pallas_call(
        _fused_forward_kernel,
        grid=(1,),
        in_specs=[
            pl.BlockSpec((kdim, mprime), lambda i: (0, 0)),
            pl.BlockSpec((cout, kdim), lambda i: (0, 0)),
            pl.BlockSpec((cout, 1), lambda i: (0, 0)),
            pl.BlockSpec((fin1, f1), lambda i: (0, 0)),
            pl.BlockSpec((1, f1), lambda i: (0, 0)),
            pl.BlockSpec((f1, f2), lambda i: (0, 0)),
            pl.BlockSpec((1, f2), lambda i: (0, 0)),
        ],
        out_specs=pl.BlockSpec((N, f2), lambda i: (0, 0)),
        out_shape=jax.ShapeDtypeStruct((N, f2), jnp.float32),
        scratch_shapes=[pltpu.VMEM((N, fin1), jnp.float32)],
        # Single grid step: full-block weight DMAs, no reduction tiling.  If the
        # batch ever grows, add a leading "parallel" row axis (v7x megacore)
        # instead of splitting the weight stream.
        compiler_params=pltpu.CompilerParams(dimension_semantics=("arbitrary",)),
    )(patches,
      params["w_conv"], params["b_conv"].reshape(cout, 1),
      params["w_dense"], params["b_dense"].reshape(1, f1),
      params["w_out"], params["b_out"].reshape(1, f2))


# --------------------------- parameter init ----------------------------------

def init_params(key, cin, hin, win, cout=C2D_COUT):
    ho, wo = hin // 2, win // 2
    fin1 = cout * ho * wo
    fout1 = int(round(0.5 * fin1))
    fout2 = hin * win
    keys = jax.random.split(key, 6)
    s = 0.05
    return {
        # Conv weight as (Cout, Cin*9) with columns in torch's (cin, kh, kw)
        # order — from a torch checkpoint: conv.weight.reshape(Cout, Cin*9).
        "w_conv": s * jax.random.normal(keys[0], (cout, cin * KSIZE * KSIZE),
                                        jnp.float32),
        "b_conv": s * jax.random.normal(keys[1], (cout,), jnp.float32),
        # dense Linear stored as (Fin1, Fout1) = torch dense.weight.T; the
        # in-kernel flatten uses torch's (c, ho, wo) order, so no permutation.
        "w_dense": (s * jax.random.normal(keys[2], (fin1, fout1),
                                          jnp.float32)).astype(jnp.bfloat16),
        "b_dense": s * jax.random.normal(keys[3], (fout1,), jnp.float32),
        # out Linear stored as (Fin, Fout) = torch out.weight.T.
        "w_out": (s * jax.random.normal(keys[4], (fout1, fout2),
                                        jnp.float32)).astype(jnp.bfloat16),
        "b_out": s * jax.random.normal(keys[5], (fout2,), jnp.float32),
    }


# --------------------------- main ---------------------------------------------

if __name__ == "__main__":
    # Small shapes consistent with the module: grid_size=[16, 16], channels=2, batch=2.
    N, CIN, HIN, WIN = 2, 2, 16, 16
    key = jax.random.PRNGKey(0)
    kx, kp = jax.random.split(key)
    x = jax.random.normal(kx, (N, CIN, HIN, WIN), jnp.float32)   # NCHW
    params = init_params(kp, CIN, HIN, WIN)

    fwd = jax.jit(first_neuro_net_forward)
    out = jax.block_until_ready(fwd(x, params))

    assert out.shape == (N, HIN * WIN), out.shape
    assert bool(jnp.all(jnp.isfinite(out)))
    print("KERNEL_OK")
</pallas_src>

<mosaic_0001>
module attributes {stable_mosaic.version = 11 : i64} {
  func.func @_fused_forward_kernel(%arg0: i32, %arg1: memref<18x512xf32, #tpu.memory_space<vmem>>, %arg2: memref<16x18xf32, #tpu.memory_space<vmem>>, %arg3: memref<16x1xf32, #tpu.memory_space<vmem>>, %arg4: memref<1024x512xbf16, #tpu.memory_space<vmem>>, %arg5: memref<1x512xf32, #tpu.memory_space<vmem>>, %arg6: memref<512x256xbf16, #tpu.memory_space<vmem>>, %arg7: memref<1x256xf32, #tpu.memory_space<vmem>>, %arg8: memref<2x256xf32, #tpu.memory_space<vmem>>, %arg9: memref<2x1024xf32, #tpu.memory_space<vmem>>) attributes {dimension_semantics = [#tpu.dimension_semantics<arbitrary>], iteration_bounds = array<i64: 1>, scalar_prefetch = 0 : i64, scratch_operands = 1 : i64, tpu.core_type = #tpu.core_type<tc>, window_params = [{pipeline_mode = #tpu.pipeline_mode<synchronous>, transform_indices = @transform_0, window_bounds = array<i64: 18, 512>}, {pipeline_mode = #tpu.pipeline_mode<synchronous>, transform_indices = @transform_1, window_bounds = array<i64: 16, 18>}, {pipeline_mode = #tpu.pipeline_mode<synchronous>, transform_indices = @transform_2, window_bounds = array<i64: 16, 1>}, {pipeline_mode = #tpu.pipeline_mode<synchronous>, transform_indices = @transform_3, window_bounds = array<i64: 1024, 512>}, {pipeline_mode = #tpu.pipeline_mode<synchronous>, transform_indices = @transform_4, window_bounds = array<i64: 1, 512>}, {pipeline_mode = #tpu.pipeline_mode<synchronous>, transform_indices = @transform_5, window_bounds = array<i64: 512, 256>}, {pipeline_mode = #tpu.pipeline_mode<synchronous>, transform_indices = @transform_6, window_bounds = array<i64: 1, 256>}, {pipeline_mode = #tpu.pipeline_mode<synchronous>, transform_indices = @transform_7, window_bounds = array<i64: 2, 256>}]} {
    %c0 = arith.constant 0 : index
    %c0_0 = arith.constant 0 : index
    %0 = vector.load %arg2[%c0, %c0_0] : memref<16x18xf32, #tpu.memory_space<vmem>>, vector<16x18xf32>
    %c0_1 = arith.constant 0 : index
    %c0_2 = arith.constant 0 : index
    %1 = vector.load %arg1[%c0_1, %c0_2] : memref<18x512xf32, #tpu.memory_space<vmem>>, vector<18x512xf32>
    %cst = arith.constant dense<0.000000e+00> : vector<16x512xf32>
    %2 = tpu.matmul %0, %1, %cst {dimension_numbers = #tpu.dot_dimension_numbers<[1], [0], [0], [1], [0, 0, 1, 1], [], []>} : vector<16x18xf32>, vector<18x512xf32>, vector<16x512xf32> -> vector<16x512xf32>
    %c0_3 = arith.constant 0 : index
    %c0_4 = arith.constant 0 : index
    %3 = vector.load %arg3[%c0_3, %c0_4] : memref<16x1xf32, #tpu.memory_space<vmem>>, vector<16x1xf32>
    %4 = vector.broadcast %3 : vector<16x1xf32> to vector<16x512xf32>
    %5 = arith.addf %2, %4 : vector<16x512xf32>
    %cst_5 = arith.constant 0.000000e+00 : f32
    %6 = vector.broadcast %cst_5 : f32 to vector<16x512xf32>
    %7 = arith.maximumf %5, %6 : vector<16x512xf32>
    %8 = vector.extract_strided_slice %7 {offsets = [0, 0], sizes = [16, 128], strides = [1, 1]} : vector<16x512xf32> to vector<16x128xf32>
    %9 = vector.extract_strided_slice %7 {offsets = [0, 128], sizes = [16, 128], strides = [1, 1]} : vector<16x512xf32> to vector<16x128xf32>
    %10 = arith.maximumf %8, %9 : vector<16x128xf32>
    %11 = vector.extract_strided_slice %7 {offsets = [0, 256], sizes = [16, 128], strides = [1, 1]} : vector<16x512xf32> to vector<16x128xf32>
    %12 = vector.extract_strided_slice %7 {offsets = [0, 384], sizes = [16, 128], strides = [1, 1]} : vector<16x512xf32> to vector<16x128xf32>
    %13 = arith.maximumf %11, %12 : vector<16x128xf32>
    %14 = arith.maximumf %10, %13 : vector<16x128xf32>
    %15 = vector.extract_strided_slice %14 {offsets = [0, 0], sizes = [1, 64], strides = [1, 1]} : vector<16x128xf32> to vector<1x64xf32>
    %c0_6 = arith.constant 0 : index
    %c0_7 = arith.constant 0 : index
    %16 = vector.load %arg9[%c0_6, %c0_7] : memref<2x1024xf32, #tpu.memory_space<vmem>>, vector<1x64xf32>
    tpu.vector_store %arg9[%c0_6, %c0_7], %15 {strides = array<i32>} : memref<2x1024xf32, #tpu.memory_space<vmem>>, vector<1x64xf32>,
    %17 = vector.extract_strided_slice %14 {offsets = [1, 0], sizes = [1, 64], strides = [1, 1]} : vector<16x128xf32> to vector<1x64xf32>
    %c0_8 = arith.constant 0 : index
    %c64 = arith.constant 64 : index
    %18 = vector.load %arg9[%c0_8, %c64] : memref<2x1024xf32, #tpu.memory_space<vmem>>, vector<1x64xf32>
    tpu.vector_store %arg9[%c0_8, %c64], %17 {strides = array<i32>} : memref<2x1024xf32, #tpu.memory_space<vmem>>, vector<1x64xf32>,
    %19 = vector.extract_strided_slice %14 {offsets = [2, 0], sizes = [1, 64], strides = [1, 1]} : vector<16x128xf32> to vector<1x64xf32>
    %c0_9 = arith.constant 0 : index
    %c128 = arith.constant 128 : index
    %20 = vector.load %arg9[%c0_9, %c128] : memref<2x1024xf32, #tpu.memory_space<vmem>>, vector<1x64xf32>
    tpu.vector_store %arg9[%c0_9, %c128], %19 {strides = array<i32>} : memref<2x1024xf32, #tpu.memory_space<vmem>>, vector<1x64xf32>,
    %21 = vector.extract_strided_slice %14 {offsets = [3, 0], sizes = [1, 64], strides = [1, 1]} : vector<16x128xf32> to vector<1x64xf32>
    %c0_10 = arith.constant 0 : index
    %c192 = arith.constant 192 : index
    %22 = vector.load %arg9[%c0_10, %c192] : memref<2x1024xf32, #tpu.memory_space<vmem>>, vector<1x64xf32>
    tpu.vector_store %arg9[%c0_10, %c192], %21 {strides = array<i32>} : memref<2x1024xf32, #tpu.memory_space<vmem>>, vector<1x64xf32>,
    %23 = vector.extract_strided_slice %14 {offsets = [4, 0], sizes = [1, 64], strides = [1, 1]} : vector<16x128xf32> to vector<1x64xf32>
    %c0_11 = arith.constant 0 : index
    %c256 = arith.constant 256 : index
    %24 = vector.load %arg9[%c0_11, %c256] : memref<2x1024xf32, #tpu.memory_space<vmem>>, vector<1x64xf32>
    tpu.vector_store %arg9[%c0_11, %c256], %23 {strides = array<i32>} : memref<2x1024xf32, #tpu.memory_space<vmem>>, vector<1x64xf32>,
    %25 = vector.extract_strided_slice %14 {offsets = [5, 0], sizes = [1, 64], strides = [1, 1]} : vector<16x128xf32> to vector<1x64xf32>
    %c0_12 = arith.constant 0 : index
    %c320 = arith.constant 320 : index
    %26 = vector.load %arg9[%c0_12, %c320] : memref<2x1024xf32, #tpu.memory_space<vmem>>, vector<1x64xf32>
    tpu.vector_store %arg9[%c0_12, %c320], %25 {strides = array<i32>} : memref<2x1024xf32, #tpu.memory_space<vmem>>, vector<1x64xf32>,
    %27 = vector.extract_strided_slice %14 {offsets = [6, 0], sizes = [1, 64], strides = [1, 1]} : vector<16x128xf32> to vector<1x64xf32>
    %c0_13 = arith.constant 0 : index
    %c384 = arith.constant 384 : index
    %28 = vector.load %arg9[%c0_13, %c384] : memref<2x1024xf32, #tpu.memory_space<vmem>>, vector<1x64xf32>
    tpu.vector_store %arg9[%c0_13, %c384], %27 {strides = array<i32>} : memref<2x1024xf32, #tpu.memory_space<vmem>>, vector<1x64xf32>,
    %29 = vector.extract_strided_slice %14 {offsets = [7, 0], sizes = [1, 64], strides = [1, 1]} : vector<16x128xf32> to vector<1x64xf32>
    %c0_14 = arith.constant 0 : index
    %c448 = arith.constant 448 : index
    %30 = vector.load %arg9[%c0_14, %c448] : memref<2x1024xf32, #tpu.memory_space<vmem>>, vector<1x64xf32>
    tpu.vector_store %arg9[%c0_14, %c448], %29 {strides = array<i32>} : memref<2x1024xf32, #tpu.memory_space<vmem>>, vector<1x64xf32>,
    %31 = vector.extract_strided_slice %14 {offsets = [8, 0], sizes = [1, 64], strides = [1, 1]} : vector<16x128xf32> to vector<1x64xf32>
    %c0_15 = arith.constant 0 : index
    %c512 = arith.constant 512 : index
    %32 = vector.load %arg9[%c0_15, %c512] : memref<2x1024xf32, #tpu.memory_space<vmem>>, vector<1x64xf32>
    tpu.vector_store %arg9[%c0_15, %c512], %31 {strides = array<i32>} : memref<2x1024xf32, #tpu.memory_space<vmem>>, vector<1x64xf32>,
    %33 = vector.extract_strided_slice %14 {offsets = [9, 0], sizes = [1, 64], strides = [1, 1]} : vector<16x128xf32> to vector<1x64xf32>
    %c0_16 = arith.constant 0 : index
    %c576 = arith.constant 576 : index
    %34 = vector.load %arg9[%c0_16, %c576] : memref<2x1024xf32, #tpu.memory_space<vmem>>, vector<1x64xf32>
    tpu.vector_store %arg9[%c0_16, %c576], %33 {strides = array<i32>} : memref<2x1024xf32, #tpu.memory_space<vmem>>, vector<1x64xf32>,
    %35 = vector.extract_strided_slice %14 {offsets = [10, 0], sizes = [1, 64], strides = [1, 1]} : vector<16x128xf32> to vector<1x64xf32>
    %c0_17 = arith.constant 0 : index
    %c640 = arith.constant 640 : index
    %36 = vector.load %arg9[%c0_17, %c640] : memref<2x1024xf32, #tpu.memory_space<vmem>>, vector<1x64xf32>
    tpu.vector_store %arg9[%c0_17, %c640], %35 {strides = array<i32>} : memref<2x1024xf32, #tpu.memory_space<vmem>>, vector<1x64xf32>,
    %37 = vector.extract_strided_slice %14 {offsets = [11, 0], sizes = [1, 64], strides = [1, 1]} : vector<16x128xf32> to vector<1x64xf32>
    %c0_18 = arith.constant 0 : index
    %c704 = arith.constant 704 : index
    %38 = vector.load %arg9[%c0_18, %c704] : memref<2x1024xf32, #tpu.memory_space<vmem>>, vector<1x64xf32>
    tpu.vector_store %arg9[%c0_18, %c704], %37 {strides = array<i32>} : memref<2x1024xf32, #tpu.memory_space<vmem>>, vector<1x64xf32>,
    %39 = vector.extract_strided_slice %14 {offsets = [12, 0], sizes = [1, 64], strides = [1, 1]} : vector<16x128xf32> to vector<1x64xf32>
    %c0_19 = arith.constant 0 : index
    %c768 = arith.constant 768 : index
    %40 = vector.load %arg9[%c0_19, %c768] : memref<2x1024xf32, #tpu.memory_space<vmem>>, vector<1x64xf32>
    tpu.vector_store %arg9[%c0_19, %c768], %39 {strides = array<i32>} : memref<2x1024xf32, #tpu.memory_space<vmem>>, vector<1x64xf32>,
    %41 = vector.extract_strided_slice %14 {offsets = [13, 0], sizes = [1, 64], strides = [1, 1]} : vector<16x128xf32> to vector<1x64xf32>
    %c0_20 = arith.constant 0 : index
    %c832 = arith.constant 832 : index
    %42 = vector.load %arg9[%c0_20, %c832] : memref<2x1024xf32, #tpu.memory_space<vmem>>, vector<1x64xf32>
    tpu.vector_store %arg9[%c0_20, %c832], %41 {strides = array<i32>} : memref<2x1024xf32, #tpu.memory_space<vmem>>, vector<1x64xf32>,
    %43 = vector.extract_strided_slice %14 {offsets = [14, 0], sizes = [1, 64], strides = [1, 1]} : vector<16x128xf32> to vector<1x64xf32>
    %c0_21 = arith.constant 0 : index
    %c896 = arith.constant 896 : index
    %44 = vector.load %arg9[%c0_21, %c896] : memref<2x1024xf32, #tpu.memory_space<vmem>>, vector<1x64xf32>
    tpu.vector_store %arg9[%c0_21, %c896], %43 {strides = array<i32>} : memref<2x1024xf32, #tpu.memory_space<vmem>>, vector<1x64xf32>,
    %45 = vector.extract_strided_slice %14 {offsets = [15, 0], sizes = [1, 64], strides = [1, 1]} : vector<16x128xf32> to vector<1x64xf32>
    %c0_22 = arith.constant 0 : index
    %c960 = arith.constant 960 : index
    %46 = vector.load %arg9[%c0_22, %c960] : memref<2x1024xf32, #tpu.memory_space<vmem>>, vector<1x64xf32>
    tpu.vector_store %arg9[%c0_22, %c960], %45 {strides = array<i32>} : memref<2x1024xf32, #tpu.memory_space<vmem>>, vector<1x64xf32>,
    %47 = vector.extract_strided_slice %14 {offsets = [0, 64], sizes = [1, 64], strides = [1, 1]} : vector<16x128xf32> to vector<1x64xf32>
    %c1 = arith.constant 1 : index
    %c0_23 = arith.constant 0 : index
    %48 = vector.load %arg9[%c1, %c0_23] : memref<2x1024xf32, #tpu.memory_space<vmem>>, vector<1x64xf32>
    tpu.vector_store %arg9[%c1, %c0_23], %47 {strides = array<i32>} : memref<2x1024xf32, #tpu.memory_space<vmem>>, vector<1x64xf32>,
    %49 = vector.extract_strided_slice %14 {offsets = [1, 64], sizes = [1, 64], strides = [1, 1]} : vector<16x128xf32> to vector<1x64xf32>
    %c1_24 = arith.constant 1 : index
    %c64_25 = arith.constant 64 : index
    %50 = vector.load %arg9[%c1_24, %c64_25] : memref<2x1024xf32, #tpu.memory_space<vmem>>, vector<1x64xf32>
    tpu.vector_store %arg9[%c1_24, %c64_25], %49 {strides = array<i32>} : memref<2x1024xf32, #tpu.memory_space<vmem>>, vector<1x64xf32>,
    %51 = vector.extract_strided_slice %14 {offsets = [2, 64], sizes = [1, 64], strides = [1, 1]} : vector<16x128xf32> to vector<1x64xf32>
    %c1_26 = arith.constant 1 : index
    %c128_27 = arith.constant 128 : index
    %52 = vector.load %arg9[%c1_26, %c128_27] : memref<2x1024xf32, #tpu.memory_space<vmem>>, vector<1x64xf32>
    tpu.vector_store %arg9[%c1_26, %c128_27], %51 {strides = array<i32>} : memref<2x1024xf32, #tpu.memory_space<vmem>>, vector<1x64xf32>,
    %53 = vector.extract_strided_slice %14 {offsets = [3, 64], sizes = [1, 64], strides = [1, 1]} : vector<16x128xf32> to vector<1x64xf32>
    %c1_28 = arith.constant 1 : index
    %c192_29 = arith.constant 192 : index
    %54 = vector.load %arg9[%c1_28, %c192_29] : memref<2x1024xf32, #tpu.memory_space<vmem>>, vector<1x64xf32>
    tpu.vector_store %arg9[%c1_28, %c192_29], %53 {strides = array<i32>} : memref<2x1024xf32, #tpu.memory_space<vmem>>, vector<1x64xf32>,
    %55 = vector.extract_strided_slice %14 {offsets = [4, 64], sizes = [1, 64], strides = [1, 1]} : vector<16x128xf32> to vector<1x64xf32>
    %c1_30 = arith.constant 1 : index
    %c256_31 = arith.constant 256 : index
    %56 = vector.load %arg9[%c1_30, %c256_31] : memref<2x1024xf32, #tpu.memory_space<vmem>>, vector<1x64xf32>
    tpu.vector_store %arg9[%c1_30, %c256_31], %55 {strides = array<i32>} : memref<2x1024xf32, #tpu.memory_space<vmem>>, vector<1x64xf32>,
    %57 = vector.extract_strided_slice %14 {offsets = [5, 64], sizes = [1, 64], strides = [1, 1]} : vector<16x128xf32> to vector<1x64xf32>
    %c1_32 = arith.constant 1 : index
    %c320_33 = arith.constant 320 : index
    %58 = vector.load %arg9[%c1_32, %c320_33] : memref<2x1024xf32, #tpu.memory_space<vmem>>, vector<1x64xf32>
    tpu.vector_store %arg9[%c1_32, %c320_33], %57 {strides = array<i32>} : memref<2x1024xf32, #tpu.memory_space<vmem>>, vector<1x64xf32>,
    %59 = vector.extract_strided_slice %14 {offsets = [6, 64], sizes = [1, 64], strides = [1, 1]} : vector<16x128xf32> to vector<1x64xf32>
    %c1_34 = arith.constant 1 : index
    %c384_35 = arith.constant 384 : index
    %60 = vector.load %arg9[%c1_34, %c384_35] : memref<2x1024xf32, #tpu.memory_space<vmem>>, vector<1x64xf32>
    tpu.vector_store %arg9[%c1_34, %c384_35], %59 {strides = array<i32>} : memref<2x1024xf32, #tpu.memory_space<vmem>>, vector<1x64xf32>,
    %61 = vector.extract_strided_slice %14 {offsets = [7, 64], sizes = [1, 64], strides = [1, 1]} : vector<16x128xf32> to vector<1x64xf32>
    %c1_36 = arith.constant 1 : index
    %c448_37 = arith.constant 448 : index
    %62 = vector.load %arg9[%c1_36, %c448_37] : memref<2x1024xf32, #tpu.memory_space<vmem>>, vector<1x64xf32>
    tpu.vector_store %arg9[%c1_36, %c448_37], %61 {strides = array<i32>} : memref<2x1024xf32, #tpu.memory_space<vmem>>, vector<1x64xf32>,
    %63 = vector.extract_strided_slice %14 {offsets = [8, 64], sizes = [1, 64], strides = [1, 1]} : vector<16x128xf32> to vector<1x64xf32>
    %c1_38 = arith.constant 1 : index
    %c512_39 = arith.constant 512 : index
    %64 = vector.load %arg9[%c1_38, %c512_39] : memref<2x1024xf32, #tpu.memory_space<vmem>>, vector<1x64xf32>
    tpu.vector_store %arg9[%c1_38, %c512_39], %63 {strides = array<i32>} : memref<2x1024xf32, #tpu.memory_space<vmem>>, vector<1x64xf32>,
    %65 = vector.extract_strided_slice %14 {offsets = [9, 64], sizes = [1, 64], strides = [1, 1]} : vector<16x128xf32> to vector<1x64xf32>
    %c1_40 = arith.constant 1 : index
    %c576_41 = arith.constant 576 : index
    %66 = vector.load %arg9[%c1_40, %c576_41] : memref<2x1024xf32, #tpu.memory_space<vmem>>, vector<1x64xf32>
    tpu.vector_store %arg9[%c1_40, %c576_41], %65 {strides = array<i32>} : memref<2x1024xf32, #tpu.memory_space<vmem>>, vector<1x64xf32>,
    %67 = vector.extract_strided_slice %14 {offsets = [10, 64], sizes = [1, 64], strides = [1, 1]} : vector<16x128xf32> to vector<1x64xf32>
    %c1_42 = arith.constant 1 : index
    %c640_43 = arith.constant 640 : index
    %68 = vector.load %arg9[%c1_42, %c640_43] : memref<2x1024xf32, #tpu.memory_space<vmem>>, vector<1x64xf32>
    tpu.vector_store %arg9[%c1_42, %c640_43], %67 {strides = array<i32>} : memref<2x1024xf32, #tpu.memory_space<vmem>>, vector<1x64xf32>,
    %69 = vector.extract_strided_slice %14 {offsets = [11, 64], sizes = [1, 64], strides = [1, 1]} : vector<16x128xf32> to vector<1x64xf32>
    %c1_44 = arith.constant 1 : index
    %c704_45 = arith.constant 704 : index
    %70 = vector.load %arg9[%c1_44, %c704_45] : memref<2x1024xf32, #tpu.memory_space<vmem>>, vector<1x64xf32>
    tpu.vector_store %arg9[%c1_44, %c704_45], %69 {strides = array<i32>} : memref<2x1024xf32, #tpu.memory_space<vmem>>, vector<1x64xf32>,
    %71 = vector.extract_strided_slice %14 {offsets = [12, 64], sizes = [1, 64], strides = [1, 1]} : vector<16x128xf32> to vector<1x64xf32>
    %c1_46 = arith.constant 1 : index
    %c768_47 = arith.constant 768 : index
    %72 = vector.load %arg9[%c1_46, %c768_47] : memref<2x1024xf32, #tpu.memory_space<vmem>>, vector<1x64xf32>
    tpu.vector_store %arg9[%c1_46, %c768_47], %71 {strides = array<i32>} : memref<2x1024xf32, #tpu.memory_space<vmem>>, vector<1x64xf32>,
    %73 = vector.extract_strided_slice %14 {offsets = [13, 64], sizes = [1, 64], strides = [1, 1]} : vector<16x128xf32> to vector<1x64xf32>
    %c1_48 = arith.constant 1 : index
    %c832_49 = arith.constant 832 : index
    %74 = vector.load %arg9[%c1_48, %c832_49] : memref<2x1024xf32, #tpu.memory_space<vmem>>, vector<1x64xf32>
    tpu.vector_store %arg9[%c1_48, %c832_49], %73 {strides = array<i32>} : memref<2x1024xf32, #tpu.memory_space<vmem>>, vector<1x64xf32>,
    %75 = vector.extract_strided_slice %14 {offsets = [14, 64], sizes = [1, 64], strides = [1, 1]} : vector<16x128xf32> to vector<1x64xf32>
    %c1_50 = arith.constant 1 : index
    %c896_51 = arith.constant 896 : index
    %76 = vector.load %arg9[%c1_50, %c896_51] : memref<2x1024xf32, #tpu.memory_space<vmem>>, vector<1x64xf32>
    tpu.vector_store %arg9[%c1_50, %c896_51], %75 {strides = array<i32>} : memref<2x1024xf32, #tpu.memory_space<vmem>>, vector<1x64xf32>,
    %77 = vector.extract_strided_slice %14 {offsets = [15, 64], sizes = [1, 64], strides = [1, 1]} : vector<16x128xf32> to vector<1x64xf32>
    %c1_52 = arith.constant 1 : index
    %c960_53 = arith.constant 960 : index
    %78 = vector.load %arg9[%c1_52, %c960_53] : memref<2x1024xf32, #tpu.memory_space<vmem>>, vector<1x64xf32>
    tpu.vector_store %arg9[%c1_52, %c960_53], %77 {strides = array<i32>} : memref<2x1024xf32, #tpu.memory_space<vmem>>, vector<1x64xf32>,
    %c0_54 = arith.constant 0 : index
    %c0_55 = arith.constant 0 : index
    %79 = vector.load %arg9[%c0_54, %c0_55] : memref<2x1024xf32, #tpu.memory_space<vmem>>, vector<2x1024xf32>
    %80 = arith.truncf %79 : vector<2x1024xf32> to vector<2x1024xbf16>
    %c0_56 = arith.constant 0 : index
    %c0_57 = arith.constant 0 : index
    %81 = vector.load %arg4[%c0_56, %c0_57] : memref<1024x512xbf16, #tpu.memory_space<vmem>>, vector<1024x512xbf16>
    %cst_58 = arith.constant dense<0.000000e+00> : vector<2x512xf32>
    %82 = tpu.matmul %80, %81, %cst_58 {dimension_numbers = #tpu.dot_dimension_numbers<[1], [0], [0], [1], [0, 0, 1, 1], [], []>} : vector<2x1024xbf16>, vector<1024x512xbf16>, vector<2x512xf32> -> vector<2x512xf32>
    %c0_59 = arith.constant 0 : index
    %c0_60 = arith.constant 0 : index
    %83 = vector.load %arg5[%c0_59, %c0_60] : memref<1x512xf32, #tpu.memory_space<vmem>>, vector<1x512xf32>
    %84 = vector.broadcast %83 : vector<1x512xf32> to vector<2x512xf32>
    %85 = arith.addf %82, %84 : vector<2x512xf32>
    %86 = arith.truncf %85 : vector<2x512xf32> to vector<2x512xbf16>
    %c0_61 = arith.constant 0 : index
    %c0_62 = arith.constant 0 : index
    %87 = vector.load %arg6[%c0_61, %c0_62] : memref<512x256xbf16, #tpu.memory_space<vmem>>, vector<512x256xbf16>
    %cst_63 = arith.constant dense<0.000000e+00> : vector<2x256xf32>
    %88 = tpu.matmul %86, %87, %cst_63 {dimension_numbers = #tpu.dot_dimension_numbers<[1], [0], [0], [1], [0, 0, 1, 1], [], []>} : vector<2x512xbf16>, vector<512x256xbf16>, vector<2x256xf32> -> vector<2x256xf32>
    %c0_64 = arith.constant 0 : index
    %c0_65 = arith.constant 0 : index
    %89 = vector.load %arg7[%c0_64, %c0_65] : memref<1x256xf32, #tpu.memory_space<vmem>>, vector<1x256xf32>
    %90 = vector.broadcast %89 : vector<1x256xf32> to vector<2x256xf32>
    %91 = arith.addf %88, %90 : vector<2x256xf32>
    %c0_66 = arith.constant 0 : index
    %c0_67 = arith.constant 0 : index
    %92 = vector.load %arg8[%c0_66, %c0_67] : memref<2x256xf32, #tpu.memory_space<vmem>>, vector<2x256xf32>
    tpu.vector_store %arg8[%c0_66, %c0_67], %91 {strides = array<i32>} : memref<2x256xf32, #tpu.memory_space<vmem>>, vector<2x256xf32>,
    return
  }
  func.func @transform_0(%arg0: i32) -> (i32, i32) {
    %c0_i32 = arith.constant 0 : i32
    %c0_i32_0 = arith.constant 0 : i32
    %c0_i32_1 = arith.constant 0 : i32
    return %c0_i32, %c0_i32_0 : i32, i32
  }
  func.func @transform_1(%arg0: i32) -> (i32, i32) {
    %c0_i32 = arith.constant 0 : i32
    %c0_i32_0 = arith.constant 0 : i32
    %c0_i32_1 = arith.constant 0 : i32
    return %c0_i32, %c0_i32_0 : i32, i32
  }
  func.func @transform_2(%arg0: i32) -> (i32, i32) {
    %c0_i32 = arith.constant 0 : i32
    %c0_i32_0 = arith.constant 0 : i32
    %c0_i32_1 = arith.constant 0 : i32
    return %c0_i32, %c0_i32_0 : i32, i32
  }
  func.func @transform_3(%arg0: i32) -> (i32, i32) {
    %c0_i32 = arith.constant 0 : i32
    %c0_i32_0 = arith.constant 0 : i32
    %c0_i32_1 = arith.constant 0 : i32
    return %c0_i32, %c0_i32_0 : i32, i32
  }
  func.func @transform_4(%arg0: i32) -> (i32, i32) {
    %c0_i32 = arith.constant 0 : i32
    %c0_i32_0 = arith.constant 0 : i32
    %c0_i32_1 = arith.constant 0 : i32
    return %c0_i32, %c0_i32_0 : i32, i32
  }
  func.func @transform_5(%arg0: i32) -> (i32, i32) {
    %c0_i32 = arith.constant 0 : i32
    %c0_i32_0 = arith.constant 0 : i32
    %c0_i32_1 = arith.constant 0 : i32
    return %c0_i32, %c0_i32_0 : i32, i32
  }
  func.func @transform_6(%arg0: i32) -> (i32, i32) {
    %c0_i32 = arith.constant 0 : i32
    %c0_i32_0 = arith.constant 0 : i32
    %c0_i32_1 = arith.constant 0 : i32
    return %c0_i32, %c0_i32_0 : i32, i32
  }
  func.func @transform_7(%arg0: i32) -> (i32, i32) {
    %c0_i32 = arith.constant 0 : i32
    %c0_i32_0 = arith.constant 0 : i32
    %c0_i32_1 = arith.constant 0 : i32
    return %c0_i32, %c0_i32_0 : i32, i32
  }
}

</mosaic_0001>

<bundles_post_ra>
// kernel: first_neuro_net_forward.1
= control target key start
LH: loop header
LB: loop body
LE: loop exit
PB: predicated region body
PF: predicated region fallthrough
CT: control target
= control target key end

     0   :  { %v3719_v7 = vmov 0.0   ;;  %vm60_vm0 = vcmask 1041408   ;;  %v3720_v13 = vmov 0   ;;  %vm53_vm1 = vcmask 146432   ;;  %s4931_s0 = inlined_call_operand.vmem [shape: f32[18,512], index: 0, kind: input, shape index: {}]   ;;  %s4932_s1 = inlined_call_operand.vmem [shape: f32[16,18], index: 1, kind: input, shape index: {}]   ;;  %s4933_s2 = inlined_call_operand.vmem [shape: f32[16,1], index: 2, kind: input, shape index: {}]   ;;  %s4934_s3 = inlined_call_operand.vmem [shape: bf16[1024,512], index: 3, kind: input, shape index: {}]   ;;  %s4935_s4 = inlined_call_operand.vmem [shape: f32[1,512], index: 4, kind: input, shape index: {}]   ;;  %s4936_s5 = inlined_call_operand.vmem [shape: bf16[512,256], index: 5, kind: input, shape index: {}]   ;;  %s4937_s6 = inlined_call_operand.vmem [shape: f32[1,256], index: 6, kind: input, shape index: {}]   ;;  %s4938_s7 = inlined_call_operand.hbm [shape: f32[2,256], index: 7, kind: output, shape index: {}]  }
   0x1   :  { %v30_v0 = vld [vmem:[%s4931_s0 + $0x8] sm:$0xff]  ;;  %v32_v2 = vld [vmem:[%s4931_s0 + $0x18] sm:$0xff]  ;;  %v29_v5 = vld [vmem:[%s4931_s0] sm:$0xff]  ;;  %137 = vmatprep.mubr.f32.mxu0 %v3719_v7  ;;  %214 = vmatprep.mubr.f32.mxu1 %v3719_v7 }
   0x2   :  { %v34_v1 = vld [vmem:[%s4931_s0 + $0x28] sm:$0xff]  ;;  %v36_v4 = vld [vmem:[%s4931_s0 + $0x38] sm:$0xff]  ;;  %v33_v6 = vld [vmem:[%s4931_s0 + $0x20] sm:$0xff]  ;;  %3211 = vset.pattern.permute.xlu0 %v3720_v13  ;;  %3212 = vset.pattern.permute.xlu1 %v3720_v13 }
   0x3   :  { %v3166_v3 = vpack.c.bf16 %v34_v1, %v30_v0  ;;  %v3170_v8 = vpack.c.bf16 %v36_v4, %v32_v2  ;;  %v3168_v9 = vpack.c.bf16 %v33_v6, %v29_v5  ;;  %v31_v10 = vld [vmem:[%s4931_s0 + $0x10] sm:$0xff]  ;;  %v38_v12 = vld [vmem:[%s4931_s0 + $0x48] sm:$0x3]  ;;  %v40_v15 = vld [vmem:[%s4931_s0 + $0x58] sm:$0x3] }
   0x4   :  { %v35_v11 = vld [vmem:[%s4931_s0 + $0x30] sm:$0xff]  ;;  %v37_v16 = vld [vmem:[%s4931_s0 + $0x40] sm:$0x3]  ;;  %v28_v20 = vld [vmem:[%s4932_s1 + $0x8] sm:$0xff] }
   0x5   :  { %3167 = vmatprep.subr.bf16.mxu0 %v3166_v3  ;;  %v3172_v14 = vpack.c.bf16 %v35_v11, %v31_v10  ;;  %3171 = vmatprep.subr.bf16.mxu1 %v3170_v8  ;;  %v39_v17 = vld [vmem:[%s4931_s0 + $0x50] sm:$0x3]  ;;  %v27_v18 = vld [vmem:[%s4932_s1] sm:$0xff] }
   0x6   :  { %3169 = vmatpush1.bf16.msra.mxu0 %v3168_v9  ;;  %v41_v19 = vld [vmem:[%s4933_s2] sm:$0xff] }
   0x7   :  { %3173 = vmatpush1.bf16.msra.mxu1 %v3172_v14  ;;  %2837 = vmatprep.subr.msk.mxu0 %vm60_vm0, %v38_v12 }
   0x8   :  { %2841 = vmatprep.subr.msk.mxu1 %vm60_vm0, %v40_v15  ;;  %45 = vperm.xlu0 %3211, %v41_v19  }
   0xa   :  { %2838 = vmatpush1.msk.msra.mxu0 %vm60_vm0, %v37_v16 }
   0xb   :  { %2842 = vmatpush1.msk.msra.mxu1 %vm60_vm0, %v39_v17  ;;  %2839 = vmatmul.mubr.msk.f32.vlgmr.msra.gmra.mrb[0].mxu0 %vm53_vm1, %v27_v18 }
   0xc   :  { %2843 = vmatmul.mubr.msk.f32.vlgmr.msra.gmra.mrb[0].mxu1 %vm53_vm1, %v27_v18  ;;  %143 = vmatprep.mubr.f32.mxu0 %v3719_v7 }
   0xd   :  { %220 = vmatprep.mubr.f32.mxu1 %v3719_v7 }
   0xf   :  { %2840 = vmatmul.mubr.msk.f32.gmra.mrb[2].mxu0 %vm53_vm1, %v28_v20 }
  0x10   :  { %2844 = vmatmul.mubr.msk.f32.gmra.mrb[2].mxu1 %vm53_vm1, %v28_v20 }
  0x11   :  { %12 = vsyncpa [#allocation4], 0  ;;  %v3213_v21 = vld [vmem:[%s4934_s3] ss:$16 sps:$4 sm:$0xff]   ;;  %v3215_v22 = vld [vmem:[%s4934_s3 + $0x4] ss:$16 sps:$4 sm:$0xff]   ;;  %v247_v61 = vlaneseq }
  0x12   :  { %v3216_v23 = vld [vmem:[%s4934_s3 + $0x200] ss:$16 sps:$4 sm:$0xff]   ;;  %v3218_v24 = vld [vmem:[%s4934_s3 + $0x204] ss:$16 sps:$4 sm:$0xff]   ;;  %2001 = vmatprep.subr.bf16.mxu1 %v3215_v22  ;;  %v3721_v59 = vmov 1983009808  }
  0x13   :  { %v3221_v25 = vld [vmem:[%s4934_s3 + $0x24] ss:$16 sps:$4 sm:$0xff]   ;;  %2002 = vmatpush1.bf16.msra.mxu1 %v3213_v21  ;;  %2042 = vmatprep.subr.bf16.mxu0 %v3218_v24  ;;  %v3219_v27 = vld [vmem:[%s4934_s3 + $0x20] ss:$16 sps:$4 sm:$0xff]   ;;  %v245_v60 = vunpack.c.l.s4 %v3721_v59  ;;  %v3936_v12 = vshrl.u32 %v247_v61, 7  ;;  %vm241_vm2 = vcmask 516096  }
  0x14   :  { %v3224_v26 = vld [vmem:[%s4934_s3 + $0x224] ss:$16 sps:$4 sm:$0xff]   ;;  %2003 = vmatprep.subr.bf16.mxu1 %v3221_v25  ;;  %2043 = vmatpush1.bf16.msra.mxu0 %v3216_v23  ;;  %v3222_v28 = vld [vmem:[%s4934_s3 + $0x220] ss:$16 sps:$4 sm:$0xff]   ;;  %s3722_s0 = smov 64   ;;  %v42_v59 = vld [vmem:[%s4933_s2 + $0x8] sm:$0xff] }
  0x15   :  { %v3227_v29 = vld [vmem:[%s4934_s3 + $0x44] ss:$16 sps:$4 sm:$0xff]   ;;  %2044 = vmatprep.subr.bf16.mxu0 %v3224_v26  ;;  %v3225_v31 = vld [vmem:[%s4934_s3 + $0x40] ss:$16 sps:$4 sm:$0xff]   ;;  %v246_v11 = vunpack.c.0.s8 %v245_v60  ;;  %vm256_vm3 = vcmask 1040896   ;;  %s3723_s29 = smov [#allocation3]  }
  0x16   :  { %v3230_v30 = vld [vmem:[%s4934_s3 + $0x244] ss:$16 sps:$4 sm:$0xff]   ;;  %v3228_v32 = vld [vmem:[%s4934_s3 + $0x240] ss:$16 sps:$4 sm:$0xff]  }
  0x17   :  { %2004 = vmatpush1.bf16.msra.mxu1 %v3219_v27  ;;  %v3233_v33 = vld [vmem:[%s4934_s3 + $0x64] ss:$16 sps:$4 sm:$0xff]   ;;  %v3231_v35 = vld [vmem:[%s4934_s3 + $0x60] ss:$16 sps:$4 sm:$0xff]   ;;  %v3951_v22 = vsub.s32 %v246_v11, %v3936_v12 }
  0x18   :  { %2005 = vmatprep.subr.bf16.mxu1 %v3227_v29  ;;  %2045 = vmatpush1.bf16.msra.mxu0 %v3222_v28  ;;  %v3236_v34 = vld [vmem:[%s4934_s3 + $0x264] ss:$16 sps:$4 sm:$0xff]   ;;  %v3234_v36 = vld [vmem:[%s4934_s3 + $0x260] ss:$16 sps:$4 sm:$0xff]  }
  0x19   :  { %2046 = vmatprep.subr.bf16.mxu0 %v3230_v30  ;;  %v3239_v37 = vld [vmem:[%s4934_s3 + $0x84] ss:$16 sps:$4 sm:$0xff]   ;;  %v3237_v39 = vld [vmem:[%s4934_s3 + $0x80] ss:$16 sps:$4 sm:$0xff]  }
  0x1a   :  { %v3242_v38 = vld [vmem:[%s4934_s3 + $0x284] ss:$16 sps:$4 sm:$0xff]   ;;  %v3240_v40 = vld [vmem:[%s4934_s3 + $0x280] ss:$16 sps:$4 sm:$0xff]  }
  0x1b   :  { %2006 = vmatpush1.bf16.msra.mxu1 %v3225_v31  ;;  %v3245_v41 = vld [vmem:[%s4934_s3 + $0xa4] ss:$16 sps:$4 sm:$0xff]   ;;  %v3243_v43 = vld [vmem:[%s4934_s3 + $0xa0] ss:$16 sps:$4 sm:$0xff]  }
  0x1c   :  { %2007 = vmatprep.subr.bf16.mxu1 %v3233_v33  ;;  %2047 = vmatpush1.bf16.msra.mxu0 %v3228_v32  ;;  %v3248_v42 = vld [vmem:[%s4934_s3 + $0x2a4] ss:$16 sps:$4 sm:$0xff]   ;;  %v3246_v44 = vld [vmem:[%s4934_s3 + $0x2a0] ss:$16 sps:$4 sm:$0xff]  }
  0x1d   :  { %2048 = vmatprep.subr.bf16.mxu0 %v3236_v34  ;;  %v3251_v45 = vld [vmem:[%s4934_s3 + $0xc4] ss:$16 sps:$4 sm:$0xff]   ;;  %v3249_v47 = vld [vmem:[%s4934_s3 + $0xc0] ss:$16 sps:$4 sm:$0xff]  }
  0x1e   :  { %v3254_v46 = vld [vmem:[%s4934_s3 + $0x2c4] ss:$16 sps:$4 sm:$0xff]   ;;  %v3252_v48 = vld [vmem:[%s4934_s3 + $0x2c0] ss:$16 sps:$4 sm:$0xff]  }
  0x1f   :  { %2008 = vmatpush1.bf16.msra.mxu1 %v3231_v35  ;;  %v3257_v49 = vld [vmem:[%s4934_s3 + $0xe4] ss:$16 sps:$4 sm:$0xff]   ;;  %v3255_v51 = vld [vmem:[%s4934_s3 + $0xe0] ss:$16 sps:$4 sm:$0xff]  }
  0x20   :  { %2009 = vmatprep.subr.bf16.mxu1 %v3239_v37  ;;  %2049 = vmatpush1.bf16.msra.mxu0 %v3234_v36  ;;  %v3260_v50 = vld [vmem:[%s4934_s3 + $0x2e4] ss:$16 sps:$4 sm:$0xff]   ;;  %v3258_v52 = vld [vmem:[%s4934_s3 + $0x2e0] ss:$16 sps:$4 sm:$0xff]  }
  0x21   :  { %2050 = vmatprep.subr.bf16.mxu0 %v3242_v38  ;;  %v3263_v53 = vld [vmem:[%s4934_s3 + $0x104] ss:$16 sps:$4 sm:$0xff]   ;;  %v3261_v55 = vld [vmem:[%s4934_s3 + $0x100] ss:$16 sps:$4 sm:$0xff]  }
  0x22   :  { %v3266_v54 = vld [vmem:[%s4934_s3 + $0x304] ss:$16 sps:$4 sm:$0xff]   ;;  %v3264_v56 = vld [vmem:[%s4934_s3 + $0x300] ss:$16 sps:$4 sm:$0xff]  }
  0x23   :  { %2010 = vmatpush1.bf16.msra.mxu1 %v3237_v39  ;;  %v3269_v58 = vld [vmem:[%s4934_s3 + $0x124] ss:$16 sps:$4 sm:$0xff]   ;;  %v3267_v62 = vld [vmem:[%s4934_s3 + $0x120] ss:$16 sps:$4 sm:$0xff]  }
  0x24   :  { %2011 = vmatprep.subr.bf16.mxu1 %v3245_v41  ;;  %2051 = vmatpush1.bf16.msra.mxu0 %v3240_v40  ;;  %v3272_v3 = vld [vmem:[%s4934_s3 + $0x324] ss:$16 sps:$4 sm:$0xff]   ;;  %v3270_v7 = vld [vmem:[%s4934_s3 + $0x320] ss:$16 sps:$4 sm:$0xff]  }
  0x25   :  { %2052 = vmatprep.subr.bf16.mxu0 %v3248_v42  ;;  %v3275_v8 = vld [vmem:[%s4934_s3 + $0x144] ss:$16 sps:$4 sm:$0xff]   ;;  %v3273_v13 = vld [vmem:[%s4934_s3 + $0x140] ss:$16 sps:$4 sm:$0xff]  }
  0x26   :  { %v3278_v17 = vld [vmem:[%s4934_s3 + $0x344] ss:$16 sps:$4 sm:$0xff]   ;;  %v3276_v19 = vld [vmem:[%s4934_s3 + $0x340] ss:$16 sps:$4 sm:$0xff]  }
  0x27   :  { %2012 = vmatpush1.bf16.msra.mxu1 %v3243_v43  ;;  %v3281_v20 = vld [vmem:[%s4934_s3 + $0x164] ss:$16 sps:$4 sm:$0xff]   ;;  %v3279_v23 = vld [vmem:[%s4934_s3 + $0x160] ss:$16 sps:$4 sm:$0xff]  }
  0x28   :  { %2013 = vmatprep.subr.bf16.mxu1 %v3251_v45  ;;  %2053 = vmatpush1.bf16.msra.mxu0 %v3246_v44  ;;  %v3284_v25 = vld [vmem:[%s4934_s3 + $0x364] ss:$16 sps:$4 sm:$0xff]   ;;  %v3282_v26 = vld [vmem:[%s4934_s3 + $0x360] ss:$16 sps:$4 sm:$0xff]  }
  0x29   :  { %2054 = vmatprep.subr.bf16.mxu0 %v3254_v46  ;;  %v3287_v27 = vld [vmem:[%s4934_s3 + $0x184] ss:$16 sps:$4 sm:$0xff]   ;;  %v3285_v30 = vld [vmem:[%s4934_s3 + $0x180] ss:$16 sps:$4 sm:$0xff]  }
  0x2a   :  { %v3290_v33 = vld [vmem:[%s4934_s3 + $0x384] ss:$16 sps:$4 sm:$0xff]   ;;  %v3288_v34 = vld [vmem:[%s4934_s3 + $0x380] ss:$16 sps:$4 sm:$0xff]  }
  0x2b   :  { %2014 = vmatpush1.bf16.msra.mxu1 %v3249_v47  ;;  %v3291_v35 = vld [vmem:[%s4934_s3 + $0x1a0] ss:$16 sps:$4 sm:$0xff]   ;;  %v3293_v36 = vld [vmem:[%s4934_s3 + $0x1a4] ss:$16 sps:$4 sm:$0xff]  }
  0x2c   :  { %2015 = vmatprep.subr.bf16.mxu1 %v3257_v49  ;;  %2055 = vmatpush1.bf16.msra.mxu0 %v3252_v48  ;;  %v3294_v40 = vld [vmem:[%s4934_s3 + $0x3a0] ss:$16 sps:$4 sm:$0xff]   ;;  %v3296_v41 = vld [vmem:[%s4934_s3 + $0x3a4] ss:$16 sps:$4 sm:$0xff]  }
  0x2d   :  { %2056 = vmatprep.subr.bf16.mxu0 %v3260_v50  ;;  %v3299_v42 = vld [vmem:[%s4934_s3 + $0x1c4] ss:$16 sps:$4 sm:$0xff]   ;;  %v3297_v44 = vld [vmem:[%s4934_s3 + $0x1c0] ss:$16 sps:$4 sm:$0xff]  }
  0x2e   :  { %v3302_v46 = vld [vmem:[%s4934_s3 + $0x3c4] ss:$16 sps:$4 sm:$0xff]   ;;  %v3300_v50 = vld [vmem:[%s4934_s3 + $0x3c0] ss:$16 sps:$4 sm:$0xff]  }
  0x2f   :  { %2016 = vmatpush1.bf16.msra.mxu1 %v3255_v51  ;;  %v3305_v47 = vld [vmem:[%s4934_s3 + $0x1e4] ss:$16 sps:$4 sm:$0xff]  }
  0x30   :  { %2017 = vmatprep.subr.bf16.mxu1 %v3263_v53  ;;  %2057 = vmatpush1.bf16.msra.mxu0 %v3258_v52  ;;  %v3303_v53 = vld [vmem:[%s4934_s3 + $0x1e0] ss:$16 sps:$4 sm:$0xff]  }
  0x31   :  { %2058 = vmatprep.subr.bf16.mxu0 %v3266_v54  ;;  %v3308_v54 = vld [vmem:[%s4934_s3 + $0x3e4] ss:$16 sps:$4 sm:$0xff]  }
  0x33   :  { %2018 = vmatpush1.bf16.msra.mxu1 %v3261_v55 }
  0x34   :  { %2059 = vmatpush1.bf16.msra.mxu0 %v3264_v56  ;;  %2019 = vmatprep.subr.bf16.mxu1 %v3269_v58  ;;  %v3306_v56 = vld [vmem:[%s4934_s3 + $0x3e0] ss:$16 sps:$4 sm:$0xff]   ;;  %v3311_v58 = vld [vmem:[%s4934_s3 + $0xc] ss:$16 sps:$4 sm:$0xff]  }
  0x35   :  { %2060 = vmatprep.subr.bf16.mxu0 %v3272_v3 }
  0x37   :  { %2020 = vmatpush1.bf16.msra.mxu1 %v3267_v62  ;;  %v3381_v62 = vld [vmem:[%s4934_s3 + $0x404] ss:$16 sps:$4 sm:$0xff]  }
  0x38   :  { %2021 = vmatprep.subr.bf16.mxu1 %v3275_v8  ;;  %2061 = vmatpush1.bf16.msra.mxu0 %v3270_v7 }
  0x39   :  { %2062 = vmatprep.subr.bf16.mxu0 %v3278_v17 }
  0x3b   :  { %2022 = vmatpush1.bf16.msra.mxu1 %v3273_v13 }
  0x3c   :  { %2023 = vmatprep.subr.bf16.mxu1 %v3281_v20  ;;  %2063 = vmatpush1.bf16.msra.mxu0 %v3276_v19  ;;  %v3379_v19 = vld [vmem:[%s4934_s3 + $0x400] ss:$16 sps:$4 sm:$0xff]  }
  0x3d   :  { %2064 = vmatprep.subr.bf16.mxu0 %v3284_v25 }
  0x3f   :  { %2024 = vmatpush1.bf16.msra.mxu1 %v3279_v23  ;;  %v3313_v23 = vld [vmem:[%s4934_s3 + $0x28] ss:$16 sps:$4 sm:$0xff]  }
  0x40   :  { %2025 = vmatprep.subr.bf16.mxu1 %v3287_v27  ;;  %2065 = vmatpush1.bf16.msra.mxu0 %v3282_v26 }
  0x41   :  { %2066 = vmatprep.subr.bf16.mxu0 %v3290_v33 }
  0x43   :  { %2026 = vmatpush1.bf16.msra.mxu1 %v3285_v30 }
  0x44   :  { %2027 = vmatprep.subr.bf16.mxu1 %v3293_v36  ;;  %2067 = vmatpush1.bf16.msra.mxu0 %v3288_v34  ;;  %v3385_v34 = vld [vmem:[%s4934_s3 + $0x420] ss:$16 sps:$4 sm:$0xff]   ;;  %v3393_v36 = vld [vmem:[%s4934_s3 + $0x444] ss:$16 sps:$4 sm:$0xff]  }
  0x45   :  { %2068 = vmatprep.subr.bf16.mxu0 %v3296_v41  ;;  %v3391_v41 = vld [vmem:[%s4934_s3 + $0x440] ss:$16 sps:$4 sm:$0xff]  }
  0x47   :  { %2028 = vmatpush1.bf16.msra.mxu1 %v3291_v35  ;;  %v3316_v35 = vld [vmem:[%s4934_s3 + $0x48] ss:$16 sps:$4 sm:$0xff]  }
  0x48   :  { %2029 = vmatprep.subr.bf16.mxu1 %v3299_v42  ;;  %2069 = vmatpush1.bf16.msra.mxu0 %v3294_v40  ;;  %v3319_v42 = vld [vmem:[%s4934_s3 + $0x68] ss:$16 sps:$4 sm:$0xff]  }
  0x49   :  { %2070 = vmatprep.subr.bf16.mxu0 %v3302_v46 }
  0x4b   :  { %2030 = vmatpush1.bf16.msra.mxu1 %v3297_v44 }
  0x4c   :  { %2031 = vmatprep.subr.bf16.mxu1 %v3305_v47  ;;  %2071 = vmatpush1.bf16.msra.mxu0 %v3300_v50  ;;  %v3322_v50 = vld [vmem:[%s4934_s3 + $0x88] ss:$16 sps:$4 sm:$0xff]  }
  0x4d   :  { %2072 = vmatprep.subr.bf16.mxu0 %v3308_v54 }
  0x4f   :  { %2032 = vmatpush1.bf16.msra.mxu1 %v3303_v53  ;;  %v3327_v53 = vld [vmem:[%s4934_s3 + $0xac] ss:$16 sps:$4 sm:$0xff]  }
  0x50   :  { %2073 = vmatpush1.bf16.msra.mxu0 %v3306_v56  ;;  %2165 = vmatprep.subr.bf16.mxu1 %v3311_v58  ;;  %v3403_v56 = vld [vmem:[%s4934_s3 + $0x480] ss:$16 sps:$4 sm:$0xff]   ;;  %v3411_v58 = vld [vmem:[%s4934_s3 + $0x4a4] ss:$16 sps:$4 sm:$0xff]  }
  0x51   :  { %2083 = vmatprep.subr.bf16.mxu0 %v3381_v62 }
  0x87   :  { %v46_v57 = vpop.permute.xlu0 %45 }
  0xde   :  { %v139_v63 = vpop.f32.mrb[0].mxu0 }
  0xdf   :  { %v140_v0 = vadd.f32 %v139_v63, %v46_v57  ;;  %v216_v1 = vpop.f32.mrb[0].mxu1  ;;  %v141_v2 = vpop.f32.mrb[1].mxu0 }
  0xe0   :  { %v217_v4 = vadd.f32 %v216_v1, %v46_v57  ;;  %v142_v5 = vadd.f32 %v141_v2, %v46_v57  ;;  %v218_v6 = vpop.f32.mrb[1].mxu1 }
  0xe1   :  { %v227_v9 = vmax.f32 %v140_v0, 0.0  ;;  %v219_v10 = vadd.f32 %v218_v6, %v46_v57 }
  0xe2   :  { %v229_v14 = vmax.f32 %v217_v4, 0.0  ;;  %v228_v15 = vmax.f32 %v142_v5, 0.0  ;;  %v3987_v39 = vpop.f32.mrb[2].mxu0 }
  0xe3   :  { %v230_v16 = vmax.f32 %v219_v10, 0.0  ;;  %v4003_v45 = vpop.f32.mrb[2].mxu1  ;;  %v147_v60 = vpop.f32.mrb[3].mxu0 }
  0xe4   :  { %v235_v18 = vmax.f32 %v227_v9, %v228_v15  ;;  %v224_v61 = vpop.f32.mrb[3].mxu1 }
  0xe5   :  { %v237_v21 = vmax.f32 %v229_v14, %v230_v16  ;;  %v3309_v14 = vld [vmem:[%s4934_s3 + $0x8] ss:$16 sps:$4 sm:$0xff]  }
  0xe7   :  { %v239_v24 = vmax.f32 %v235_v18, %v237_v21  ;;  %v3315_v18 = vld [vmem:[%s4934_s3 + $0x2c] ss:$16 sps:$4 sm:$0xff]  }
  0xe9   :  { %v267_v28 = vcombine.high %v239_v24, %v239_v24  ;;  %v250_v29 = vrot.slane %v239_v24, %v3951_v22  ;;  %242 = vst.msk [vmem:[#allocation2] sm:$0x1] %vm241_vm2, %v239_v24  ;;  %v3387_v24 = vld [vmem:[%s4934_s3 + $0x424] ss:$16 sps:$4 sm:$0xff]  }
  0xeb   :  { %v274_v31 = vrot.slane %v267_v28, %v3951_v22  ;;  %341 = vrot.lane.b32.xlu0 %v250_v29, %s3722_s0  ;;  %v258_v32 = vcombine.high %v250_v29, %v250_v29  ;;  %v251_v43 = vrot.slane %v250_v29, 7  ;;  %v3318_v29 = vld [vmem:[%s4934_s3 + $0x4c] ss:$16 sps:$4 sm:$0xff]  }
  0xed   :  { %347 = vrot.lane.b32.xlu1 %v258_v32, %s3722_s0  ;;  %v283_v37 = vcombine.high %v274_v31, %v274_v31  ;;  %v261_v38 = vrot.slane %v258_v32, 7  ;;  %260 = vst.msk [vmem:[#allocation2 + $0x2] sm:$0x1] %vm241_vm2, %v258_v32  ;;  %276 = vst.msk [vmem:[#allocation2 + $0x4] sm:$0x1] %vm241_vm2, %v274_v31  ;;  %v252_v51 = vrot.slane %v251_v43, 2 }
  0xee   :  { %v277_v52 = vrot.slane %v274_v31, 7  ;;  %v3399_v43 = vld [vmem:[%s4934_s3 + $0x464] ss:$16 sps:$4 sm:$0xff]  }
  0xef   :  { %359 = vrot.lane.b32.xlu0 %v283_v37, %s3722_s0  ;;  %285 = vst.msk [vmem:[#allocation2 + $0x6] sm:$0x1] %vm241_vm2, %v283_v37  ;;  %v262_v48 = vrot.slane %v261_v38, 2  ;;  %v286_v49 = vrot.slane %v283_v37, 7 }
  0xf0   :  { %v278_v57 = vrot.slane %v277_v52, 2 }
  0xf1   :  { %353 = vrot.lane.b32.xlu1 %v274_v31, %s3722_s0  ;;  %v287_v55 = vrot.slane %v286_v49, 2  ;;  %v3397_v49 = vld [vmem:[%s4934_s3 + $0x460] ss:$16 sps:$4 sm:$0xff]  }
  0xf3   :  { %263 = vrot.lane.b32.xlu0 %v262_v48, %s3722_s0 }
  0xf5   :  { %253 = vrot.lane.b32.xlu1 %v252_v51, %s3722_s0 }
  0xf7   :  { %288 = vrot.lane.b32.xlu0 %v287_v55, %s3722_s0 }
  0xf9   :  { %279 = vrot.lane.b32.xlu1 %v278_v57, %s3722_s0 }
  0xfd   :  { %50 = vperm.xlu1 %3212, %v42_v59  }
 0x15d   :  { %v342_v63 = vpop.permute.xlu0 %341 }
 0x15e   :  { %344 = vst.msk [vmem:[#allocation2 + $0x1] sm:$0x1] %vm241_vm2, %v342_v63 }
 0x15f   :  { %346 = vst.msk [vmem:[#allocation2 + $0x1] sm:$0x1] %vm256_vm3, %v252_v51  ;;  %v348_v0 = vpop.permute.xlu1 %347  ;;  %v3405_v51 = vld [vmem:[%s4934_s3 + $0x484] ss:$16 sps:$4 sm:$0xff]  }
 0x160   :  { %350 = vst.msk [vmem:[#allocation2 + $0x3] sm:$0x1] %vm241_vm2, %v348_v0  ;;  %v3409_v0 = vld [vmem:[%s4934_s3 + $0x4a0] ss:$16 sps:$4 sm:$0xff]  }
 0x161   :  { %352 = vst.msk [vmem:[#allocation2 + $0x3] sm:$0x1] %vm256_vm3, %v262_v48  ;;  %v360_v1 = vpop.permute.xlu0 %359 }
 0x162   :  { %362 = vst.msk [vmem:[#allocation2 + $0x7] sm:$0x1] %vm241_vm2, %v360_v1  ;;  %v3328_v1 = vld [vmem:[%s4934_s3 + $0xc8] ss:$16 sps:$4 sm:$0xff]  }
 0x163   :  { %364 = vst.msk [vmem:[#allocation2 + $0x7] sm:$0x1] %vm256_vm3, %v287_v55  ;;  %v354_v2 = vpop.permute.xlu1 %353 }
 0x164   :  { %356 = vst.msk [vmem:[#allocation2 + $0x5] sm:$0x1] %vm241_vm2, %v354_v2  ;;  %v3417_v2 = vld [vmem:[%s4934_s3 + $0x4c4] ss:$16 sps:$4 sm:$0xff]  }
 0x165   :  { %358 = vst.msk [vmem:[#allocation2 + $0x5] sm:$0x1] %vm256_vm3, %v278_v57  ;;  %v264_v3 = vpop.permute.xlu0 %263  ;;  %v3325_v57 = vld [vmem:[%s4934_s3 + $0xa8] ss:$16 sps:$4 sm:$0xff]  }
 0x166   :  { %266 = vst.msk [vmem:[#allocation2 + $0x2] sm:$0x1] %vm256_vm3, %v264_v3 }
 0x167   :  { %v254_v4 = vpop.permute.xlu1 %253 }
 0x168   :  { %257 = vst.msk [vmem:[#allocation2] sm:$0x1] %vm256_vm3, %v254_v4  ;;  %v3333_v4 = vld [vmem:[%s4934_s3 + $0xec] ss:$16 sps:$4 sm:$0xff]  }
 0x169   :  { %v289_v5 = vpop.permute.xlu0 %288 }
 0x16a   :  { %291 = vst.msk [vmem:[#allocation2 + $0x6] sm:$0x1] %vm256_vm3, %v289_v5 }
 0x16b   :  { %v280_v6 = vpop.permute.xlu1 %279 }
 0x16c   :  { %282 = vst.msk [vmem:[#allocation2 + $0x4] sm:$0x1] %vm256_vm3, %v280_v6  ;;  %v3415_v6 = vld [vmem:[%s4934_s3 + $0x4c0] ss:$16 sps:$4 sm:$0xff]  }
 0x173   :  { %v389_v7 = vld [vmem:[#allocation2] sm:$0xff] }
 0x174   :  { %v400_v8 = vrot.slane %v389_v7, %v3951_v22  ;;  %v393_v9 = vcombine.high %v389_v7, %v389_v7  ;;  %v3331_v7 = vld [vmem:[%s4934_s3 + $0xe8] ss:$16 sps:$4 sm:$0xff]  }
 0x176   :  { %v408_v10 = vcombine.high %v400_v8, %v400_v8  ;;  %v407_v11 = vrot.slane %v393_v9, %v3951_v22  ;;  %v4054_v16 = vpack.c.bf16 %v400_v8, %v400_v8  ;;  %v3423_v8 = vld [vmem:[%s4934_s3 + $0x4e4] ss:$16 sps:$4 sm:$0xff]   ;;  %v3336_v9 = vld [vmem:[%s4934_s3 + $0x10c] ss:$16 sps:$4 sm:$0xff]  }
 0x178   :  { %v436_v13 = vpack.c.bf16 %v408_v10, %v408_v10  ;;  %v409_v15 = vcombine.high %v407_v11, %v407_v11  ;;  %v4065_v21 = vpack.c.bf16 %v407_v11, %v407_v11  ;;  %v3421_v10 = vld [vmem:[%s4934_s3 + $0x4e0] ss:$16 sps:$4 sm:$0xff]   ;;  %v3334_v11 = vld [vmem:[%s4934_s3 + $0x108] ss:$16 sps:$4 sm:$0xff]  }
 0x17a   :  { %2033 = vmatprep.mubr.bf16.mxu1 %v436_v13  ;;  %v4056_v17 = vpack.c.bf16 %v409_v15, %v409_v15  ;;  %v3427_v15 = vld [vmem:[%s4934_s3 + $0x500] ss:$16 sps:$4 sm:$0xff]  }
 0x17b   :  { %2034 = vmatmul.mubr.bf16.vlgmr.msra.gmra.mrb[4].mxu1 %v4054_v16 }
 0x17c   :  { %2166 = vmatpush1.bf16.msra.mxu1 %v3309_v14  ;;  %v51_v20 = vpop.permute.xlu1 %50  ;;  %2074 = vmatprep.mubr.bf16.mxu0 %v4056_v17  ;;  %v3339_v14 = vld [vmem:[%s4934_s3 + $0x12c] ss:$16 sps:$4 sm:$0xff]  }
 0x17d   :  { %v146_v25 = vadd.f32 %v3987_v39, %v51_v20  ;;  %v148_v26 = vadd.f32 %v147_v60, %v51_v20  ;;  %v223_v27 = vadd.f32 %v4003_v45, %v51_v20  ;;  %v225_v28 = vadd.f32 %v224_v61, %v51_v20  ;;  %2197 = vmatprep.mubr.bf16.mxu1 %v436_v13  ;;  %v3321_v39 = vld [vmem:[%s4934_s3 + $0x6c] ss:$16 sps:$4 sm:$0xff]   ;;  %v3429_v13 = vld [vmem:[%s4934_s3 + $0x504] ss:$16 sps:$4 sm:$0xff]  }
 0x17e   :  { %2075 = vmatmul.mubr.bf16.vlgmr.msra.gmra.mrb[4].mxu0 %v4065_v21  ;;  %2167 = vmatprep.subr.bf16.mxu1 %v3315_v18  ;;  %v3324_v45 = vld [vmem:[%s4934_s3 + $0x8c] ss:$16 sps:$4 sm:$0xff]   ;;  %v3337_v18 = vld [vmem:[%s4934_s3 + $0x128] ss:$16 sps:$4 sm:$0xff]  }
 0x17f   :  { %v231_v30 = vmax.f32 %v146_v25, 0.0  ;;  %v232_v31 = vmax.f32 %v148_v26, 0.0  ;;  %v233_v32 = vmax.f32 %v223_v27, 0.0  ;;  %v234_v33 = vmax.f32 %v225_v28, 0.0  ;;  %2084 = vmatpush1.bf16.msra.mxu0 %v3379_v19  ;;  %v3330_v60 = vld [vmem:[%s4934_s3 + $0xcc] ss:$16 sps:$4 sm:$0xff]  }
 0x180   :  { %2168 = vmatpush1.bf16.msra.mxu1 %v3313_v23  ;;  %2085 = vmatprep.subr.bf16.mxu0 %v3387_v24  ;;  %v3435_v19 = vld [vmem:[%s4934_s3 + $0x524] ss:$16 sps:$4 sm:$0xff]   ;;  %v3342_v20 = vld [vmem:[%s4934_s3 + $0x14c] ss:$16 sps:$4 sm:$0xff]   ;;  %v3433_v23 = vld [vmem:[%s4934_s3 + $0x520] ss:$16 sps:$4 sm:$0xff]  }
 0x181   :  { %v236_v37 = vmax.f32 %v231_v30, %v232_v31  ;;  %v238_v38 = vmax.f32 %v233_v32, %v234_v33  ;;  %2169 = vmatprep.subr.bf16.mxu1 %v3318_v29  ;;  %v3340_v24 = vld [vmem:[%s4934_s3 + $0x148] ss:$16 sps:$4 sm:$0xff]   ;;  %v3441_v25 = vld [vmem:[%s4934_s3 + $0x544] ss:$16 sps:$4 sm:$0xff]   ;;  %v3345_v26 = vld [vmem:[%s4934_s3 + $0x16c] ss:$16 sps:$4 sm:$0xff]  }
 0x182   :  { %v3439_v27 = vld [vmem:[%s4934_s3 + $0x540] ss:$16 sps:$4 sm:$0xff]   ;;  %v3343_v28 = vld [vmem:[%s4934_s3 + $0x168] ss:$16 sps:$4 sm:$0xff]   ;;  %v3447_v29 = vld [vmem:[%s4934_s3 + $0x564] ss:$16 sps:$4 sm:$0xff]  }
 0x183   :  { %v240_v40 = vmax.f32 %v236_v37, %v238_v38  ;;  %2086 = vmatpush1.bf16.msra.mxu0 %v3385_v34  ;;  %v3348_v30 = vld [vmem:[%s4934_s3 + $0x18c] ss:$16 sps:$4 sm:$0xff]   ;;  %v3445_v31 = vld [vmem:[%s4934_s3 + $0x560] ss:$16 sps:$4 sm:$0xff]   ;;  %v3346_v32 = vld [vmem:[%s4934_s3 + $0x188] ss:$16 sps:$4 sm:$0xff]  }
 0x184   :  { %2170 = vmatpush1.bf16.msra.mxu1 %v3316_v35  ;;  %2087 = vmatprep.subr.bf16.mxu0 %v3393_v36  ;;  %v3453_v33 = vld [vmem:[%s4934_s3 + $0x584] ss:$16 sps:$4 sm:$0xff]   ;;  %v3351_v34 = vld [vmem:[%s4934_s3 + $0x1ac] ss:$16 sps:$4 sm:$0xff]   ;;  %v3451_v35 = vld [vmem:[%s4934_s3 + $0x580] ss:$16 sps:$4 sm:$0xff]  }
 0x185   :  { %2171 = vmatprep.subr.bf16.mxu1 %v3321_v39  ;;  %v300_v44 = vrot.slane %v240_v40, %v3951_v22  ;;  %292 = vst.msk [vmem:[#allocation2 + $0x8] sm:$0x1] %vm241_vm2, %v240_v40  ;;  %v316_v46 = vcombine.high %v240_v40, %v240_v40  ;;  %v3349_v36 = vld [vmem:[%s4934_s3 + $0x1a8] ss:$16 sps:$4 sm:$0xff]   ;;  %v3459_v37 = vld [vmem:[%s4934_s3 + $0x5a4] ss:$16 sps:$4 sm:$0xff]  }
 0x186   :  { %v3354_v38 = vld [vmem:[%s4934_s3 + $0x1cc] ss:$16 sps:$4 sm:$0xff]   ;;  %v3457_v39 = vld [vmem:[%s4934_s3 + $0x5a0] ss:$16 sps:$4 sm:$0xff]   ;;  %v3352_v40 = vld [vmem:[%s4934_s3 + $0x1c8] ss:$16 sps:$4 sm:$0xff]  }
 0x187   :  { %365 = vrot.lane.b32.xlu0 %v300_v44, %s3722_s0  ;;  %v307_v47 = vcombine.high %v300_v44, %v300_v44  ;;  %v323_v48 = vrot.slane %v316_v46, %v3951_v22  ;;  %2088 = vmatpush1.bf16.msra.mxu0 %v3391_v41  ;;  %v301_v54 = vrot.slane %v300_v44, 7  ;;  %v3465_v41 = vld [vmem:[%s4934_s3 + $0x5c4] ss:$16 sps:$4 sm:$0xff]   ;;  %v3355_v44 = vld [vmem:[%s4934_s3 + $0x1e8] ss:$16 sps:$4 sm:$0xff]  }
 0x188   :  { %2172 = vmatpush1.bf16.msra.mxu1 %v3319_v42  ;;  %2089 = vmatprep.subr.bf16.mxu0 %v3399_v43  ;;  %v3357_v42 = vld [vmem:[%s4934_s3 + $0x1ec] ss:$16 sps:$4 sm:$0xff]   ;;  %v3463_v43 = vld [vmem:[%s4934_s3 + $0x5c0] ss:$16 sps:$4 sm:$0xff]  }
 0x189   :  { %371 = vrot.lane.b32.xlu1 %v307_v47, %s3722_s0  ;;  %309 = vst.msk [vmem:[#allocation2 + $0xa] sm:$0x1] %vm241_vm2, %v307_v47  ;;  %2173 = vmatprep.subr.bf16.mxu1 %v3324_v45  ;;  %325 = vst.msk [vmem:[#allocation2 + $0xc] sm:$0x1] %vm241_vm2, %v323_v48  ;;  %v332_v52 = vcombine.high %v323_v48, %v323_v48  ;;  %v310_v55 = vrot.slane %v307_v47, 7  ;;  %v4135_v59 = vrot.slane %v301_v54, 2 }
 0x18a   :  { %v326_v61 = vrot.slane %v323_v48, 7  ;;  %v3471_v45 = vld [vmem:[%s4934_s3 + $0x5e4] ss:$16 sps:$4 sm:$0xff]   ;;  %v3360_v46 = vld [vmem:[%s4934_s3 + $0x20c] ss:$16 sps:$4 sm:$0xff]  }
 0x18b   :  { %377 = vrot.lane.b32.xlu0 %v323_v48, %s3722_s0  ;;  %334 = vst.msk [vmem:[#allocation2 + $0xe] sm:$0x1] %vm241_vm2, %v332_v52  ;;  %2090 = vmatpush1.bf16.msra.mxu0 %v3397_v49  ;;  %v4142_v62 = vrot.slane %v310_v55, 2  ;;  %v335_v63 = vrot.slane %v332_v52, 7  ;;  %v3469_v47 = vld [vmem:[%s4934_s3 + $0x5e0] ss:$16 sps:$4 sm:$0xff]  }
 0x18c   :  { %2174 = vmatpush1.bf16.msra.mxu1 %v3322_v50  ;;  %2091 = vmatprep.subr.bf16.mxu0 %v3405_v51  ;;  %v4155_v3 = vrot.slane %v326_v61, 2  ;;  %v3358_v48 = vld [vmem:[%s4934_s3 + $0x208] ss:$16 sps:$4 sm:$0xff]   ;;  %v3363_v49 = vld [vmem:[%s4934_s3 + $0x22c] ss:$16 sps:$4 sm:$0xff]  }
 0x18d   :  { %383 = vrot.lane.b32.xlu1 %v332_v52, %s3722_s0  ;;  %2175 = vmatprep.subr.bf16.mxu1 %v3327_v53  ;;  %v4162_v5 = vrot.slane %v335_v63, 2  ;;  %v3477_v50 = vld [vmem:[%s4934_s3 + $0x604] ss:$16 sps:$4 sm:$0xff]   ;;  %v3361_v51 = vld [vmem:[%s4934_s3 + $0x228] ss:$16 sps:$4 sm:$0xff]  }
 0x18e   :  { %v3366_v52 = vld [vmem:[%s4934_s3 + $0x24c] ss:$16 sps:$4 sm:$0xff]   ;;  %v3364_v53 = vld [vmem:[%s4934_s3 + $0x248] ss:$16 sps:$4 sm:$0xff]  }
 0x18f   :  { %303 = vrot.lane.b32.xlu0 %v4135_v59, %s3722_s0  ;;  %2092 = vmatpush1.bf16.msra.mxu0 %v3403_v56  ;;  %v3372_v54 = vld [vmem:[%s4934_s3 + $0x28c] ss:$16 sps:$4 sm:$0xff]   ;;  %v3370_v55 = vld [vmem:[%s4934_s3 + $0x288] ss:$16 sps:$4 sm:$0xff]  }
 0x190   :  { %2176 = vmatpush1.bf16.msra.mxu1 %v3325_v57  ;;  %2093 = vmatprep.subr.bf16.mxu0 %v3411_v58  ;;  %v3375_v56 = vld [vmem:[%s4934_s3 + $0x2ac] ss:$16 sps:$4 sm:$0xff]   ;;  %v3373_v57 = vld [vmem:[%s4934_s3 + $0x2a8] ss:$16 sps:$4 sm:$0xff]  }
 0x191   :  { %312 = vrot.lane.b32.xlu1 %v4142_v62, %s3722_s0  ;;  %2177 = vmatprep.subr.bf16.mxu1 %v3330_v60  ;;  %v3378_v58 = vld [vmem:[%s4934_s3 + $0x2cc] ss:$16 sps:$4 sm:$0xff]   ;;  %v3376_v60 = vld [vmem:[%s4934_s3 + $0x2c8] ss:$16 sps:$4 sm:$0xff]  }
 0x192   :  { %v3384_v61 = vld [vmem:[%s4934_s3 + $0x2ec] ss:$16 sps:$4 sm:$0xff]   ;;  %v3382_v63 = vld [vmem:[%s4934_s3 + $0x2e8] ss:$16 sps:$4 sm:$0xff]  }
 0x193   :  { %328 = vrot.lane.b32.xlu0 %v4155_v3, %s3722_s0  ;;  %2094 = vmatpush1.bf16.msra.mxu0 %v3409_v0  ;;  %v3390_v0 = vld [vmem:[%s4934_s3 + $0x30c] ss:$16 sps:$4 sm:$0xff]  }
 0x194   :  { %2178 = vmatpush1.bf16.msra.mxu1 %v3328_v1  ;;  %2095 = vmatprep.subr.bf16.mxu0 %v3417_v2  ;;  %v3388_v1 = vld [vmem:[%s4934_s3 + $0x308] ss:$16 sps:$4 sm:$0xff]   ;;  %v3396_v2 = vld [vmem:[%s4934_s3 + $0x32c] ss:$16 sps:$4 sm:$0xff]  }
 0x195   :  { %337 = vrot.lane.b32.xlu1 %v4162_v5, %s3722_s0  ;;  %2179 = vmatprep.subr.bf16.mxu1 %v3333_v4  ;;  %v3394_v4 = vld [vmem:[%s4934_s3 + $0x328] ss:$16 sps:$4 sm:$0xff]  }
 0x197   :  { %2096 = vmatpush1.bf16.msra.mxu0 %v3415_v6  ;;  %v3402_v6 = vld [vmem:[%s4934_s3 + $0x34c] ss:$16 sps:$4 sm:$0xff]  }
 0x198   :  { %2180 = vmatpush1.bf16.msra.mxu1 %v3331_v7  ;;  %2097 = vmatprep.subr.bf16.mxu0 %v3423_v8  ;;  %v3400_v7 = vld [vmem:[%s4934_s3 + $0x348] ss:$16 sps:$4 sm:$0xff]   ;;  %v3408_v8 = vld [vmem:[%s4934_s3 + $0x36c] ss:$16 sps:$4 sm:$0xff]  }
 0x199   :  { %2181 = vmatprep.subr.bf16.mxu1 %v3336_v9  ;;  %v3406_v9 = vld [vmem:[%s4934_s3 + $0x368] ss:$16 sps:$4 sm:$0xff]  }
 0x19b   :  { %2098 = vmatpush1.bf16.msra.mxu0 %v3421_v10  ;;  %v3414_v10 = vld [vmem:[%s4934_s3 + $0x38c] ss:$16 sps:$4 sm:$0xff]  }
 0x19c   :  { %2182 = vmatpush1.bf16.msra.mxu1 %v3334_v11  ;;  %2099 = vmatprep.subr.bf16.mxu0 %v3429_v13  ;;  %v3412_v11 = vld [vmem:[%s4934_s3 + $0x388] ss:$16 sps:$4 sm:$0xff]   ;;  %v3420_v13 = vld [vmem:[%s4934_s3 + $0x3ac] ss:$16 sps:$4 sm:$0xff]  }
 0x19d   :  { %2183 = vmatprep.subr.bf16.mxu1 %v3339_v14  ;;  %v3418_v14 = vld [vmem:[%s4934_s3 + $0x3a8] ss:$16 sps:$4 sm:$0xff]  }
 0x19f   :  { %2100 = vmatpush1.bf16.msra.mxu0 %v3427_v15  ;;  %v3426_v15 = vld [vmem:[%s4934_s3 + $0x3cc] ss:$16 sps:$4 sm:$0xff]  }
 0x1a0   :  { %2184 = vmatpush1.bf16.msra.mxu1 %v3337_v18  ;;  %2101 = vmatprep.subr.bf16.mxu0 %v3435_v19  ;;  %v3424_v18 = vld [vmem:[%s4934_s3 + $0x3c8] ss:$16 sps:$4 sm:$0xff]   ;;  %v3432_v19 = vld [vmem:[%s4934_s3 + $0x3ec] ss:$16 sps:$4 sm:$0xff]  }
 0x1a1   :  { %2185 = vmatprep.subr.bf16.mxu1 %v3342_v20  ;;  %v3430_v20 = vld [vmem:[%s4934_s3 + $0x3e8] ss:$16 sps:$4 sm:$0xff]  }
 0x1a3   :  { %2102 = vmatpush1.bf16.msra.mxu0 %v3433_v23  ;;  %v3438_v23 = vld [vmem:[%s4934_s3 + $0x40c] ss:$16 sps:$4 sm:$0xff]  }
 0x1a4   :  { %2186 = vmatpush1.bf16.msra.mxu1 %v3340_v24  ;;  %2103 = vmatprep.subr.bf16.mxu0 %v3441_v25  ;;  %v3436_v24 = vld [vmem:[%s4934_s3 + $0x408] ss:$16 sps:$4 sm:$0xff]  }
 0x1a5   :  { %2187 = vmatprep.subr.bf16.mxu1 %v3345_v26  ;;  %v3444_v26 = vld [vmem:[%s4934_s3 + $0x42c] ss:$16 sps:$4 sm:$0xff]  }
 0x1a7   :  { %2104 = vmatpush1.bf16.msra.mxu0 %v3439_v27 }
 0x1a8   :  { %2188 = vmatpush1.bf16.msra.mxu1 %v3343_v28  ;;  %2105 = vmatprep.subr.bf16.mxu0 %v3447_v29  ;;  %v3442_v28 = vld [vmem:[%s4934_s3 + $0x428] ss:$16 sps:$4 sm:$0xff]  }
 0x1a9   :  { %2189 = vmatprep.subr.bf16.mxu1 %v3348_v30  ;;  %v3450_v30 = vld [vmem:[%s4934_s3 + $0x44c] ss:$16 sps:$4 sm:$0xff]  }
 0x1ab   :  { %2106 = vmatpush1.bf16.msra.mxu0 %v3445_v31  ;;  %v3456_v31 = vld [vmem:[%s4934_s3 + $0x46c] ss:$16 sps:$4 sm:$0xff]  }
 0x1ac   :  { %2190 = vmatpush1.bf16.msra.mxu1 %v3346_v32  ;;  %2107 = vmatprep.subr.bf16.mxu0 %v3453_v33  ;;  %v3454_v32 = vld [vmem:[%s4934_s3 + $0x468] ss:$16 sps:$4 sm:$0xff]  }
 0x1ad   :  { %2191 = vmatprep.subr.bf16.mxu1 %v3351_v34 }
 0x1af   :  { %2108 = vmatpush1.bf16.msra.mxu0 %v3451_v35  ;;  %v3460_v35 = vld [vmem:[%s4934_s3 + $0x488] ss:$16 sps:$4 sm:$0xff]  }
 0x1b0   :  { %2192 = vmatpush1.bf16.msra.mxu1 %v3349_v36  ;;  %2109 = vmatprep.subr.bf16.mxu0 %v3459_v37  ;;  %v3468_v36 = vld [vmem:[%s4934_s3 + $0x4ac] ss:$16 sps:$4 sm:$0xff]   ;;  %v3466_v37 = vld [vmem:[%s4934_s3 + $0x4a8] ss:$16 sps:$4 sm:$0xff]  }
 0x1b1   :  { %2193 = vmatprep.subr.bf16.mxu1 %v3354_v38  ;;  %v3474_v38 = vld [vmem:[%s4934_s3 + $0x4cc] ss:$16 sps:$4 sm:$0xff]  }
 0x1b3   :  { %2110 = vmatpush1.bf16.msra.mxu0 %v3457_v39 }
 0x1b4   :  { %2194 = vmatpush1.bf16.msra.mxu1 %v3352_v40  ;;  %2111 = vmatprep.subr.bf16.mxu0 %v3465_v41  ;;  %v3472_v40 = vld [vmem:[%s4934_s3 + $0x4c8] ss:$16 sps:$4 sm:$0xff]  }
 0x1b5   :  { %2195 = vmatprep.subr.bf16.mxu1 %v3357_v42 }
 0x1b7   :  { %2112 = vmatpush1.bf16.msra.mxu0 %v3463_v43  ;;  %v3480_v43 = vld [vmem:[%s4934_s3 + $0x4ec] ss:$16 sps:$4 sm:$0xff]  }
 0x1b8   :  { %2196 = vmatpush1.bf16.msra.mxu1 %v3355_v44  ;;  %2113 = vmatprep.subr.bf16.mxu0 %v3471_v45 }
 0x1b9   :  { %2206 = vmatprep.subr.bf16.mxu1 %v3360_v46 }
 0x1bb   :  { %2198 = vmatmul.mubr.bf16.vlgmr.msra.gmra.mrb[8].mxu1 %v4054_v16  ;;  %2114 = vmatpush1.bf16.msra.mxu0 %v3469_v47  ;;  %v3369_v16 = vld [vmem:[%s4934_s3 + $0x26c] ss:$16 sps:$4 sm:$0xff]   ;;  %v3475_v47 = vld [vmem:[%s4934_s3 + $0x600] ss:$16 sps:$4 sm:$0xff]  }
 0x1bc   :  { %2207 = vmatpush1.bf16.msra.mxu1 %v3358_v48  ;;  %2238 = vmatprep.mubr.bf16.mxu1 %v4056_v17  ;;  %v3367_v17 = vld [vmem:[%s4934_s3 + $0x268] ss:$16 sps:$4 sm:$0xff]  }
 0x1bd   :  { %2208 = vmatprep.subr.bf16.mxu1 %v3363_v49  ;;  %2124 = vmatprep.subr.bf16.mxu0 %v3477_v50  ;;  %v3478_v48 = vld [vmem:[%s4934_s3 + $0x4e8] ss:$16 sps:$4 sm:$0xff]  }
 0x1c0   :  { %2209 = vmatpush1.bf16.msra.mxu1 %v3361_v51 }
 0x1c1   :  { %2210 = vmatprep.subr.bf16.mxu1 %v3366_v52  ;;  %v3487_v52 = vld [vmem:[%s4934_s3 + $0x50c] ss:$16 sps:$4 sm:$0xff]  }
 0x1c4   :  { %2211 = vmatpush1.bf16.msra.mxu1 %v3364_v53  ;;  %v3482_v53 = vld [vmem:[%s4934_s3 + $0x620] ss:$16 sps:$4 sm:$0xff]  }
 0x1c5   :  { %2212 = vmatprep.subr.bf16.mxu1 %v3369_v16  ;;  %v3485_v16 = vld [vmem:[%s4934_s3 + $0x508] ss:$16 sps:$4 sm:$0xff]  }
 0x1c8   :  { %2213 = vmatpush1.bf16.msra.mxu1 %v3367_v17  ;;  %v3490_v17 = vld [vmem:[%s4934_s3 + $0x644] ss:$16 sps:$4 sm:$0xff]  }
 0x1c9   :  { %2214 = vmatprep.subr.bf16.mxu1 %v3372_v54  ;;  %v3493_v54 = vld [vmem:[%s4934_s3 + $0x52c] ss:$16 sps:$4 sm:$0xff]  }
 0x1cc   :  { %2215 = vmatpush1.bf16.msra.mxu1 %v3370_v55  ;;  %v3488_v55 = vld [vmem:[%s4934_s3 + $0x640] ss:$16 sps:$4 sm:$0xff]  }
 0x1cd   :  { %2216 = vmatprep.subr.bf16.mxu1 %v3375_v56  ;;  %v3491_v56 = vld [vmem:[%s4934_s3 + $0x528] ss:$16 sps:$4 sm:$0xff]  }
 0x1d0   :  { %2217 = vmatpush1.bf16.msra.mxu1 %v3373_v57  ;;  %v3496_v57 = vld [vmem:[%s4934_s3 + $0x664] ss:$16 sps:$4 sm:$0xff]  }
 0x1d1   :  { %2218 = vmatprep.subr.bf16.mxu1 %v3378_v58  ;;  %v3499_v58 = vld [vmem:[%s4934_s3 + $0x54c] ss:$16 sps:$4 sm:$0xff]  }
 0x1d4   :  { %2219 = vmatpush1.bf16.msra.mxu1 %v3376_v60  ;;  %v3494_v60 = vld [vmem:[%s4934_s3 + $0x660] ss:$16 sps:$4 sm:$0xff]  }
 0x1d5   :  { %2220 = vmatprep.subr.bf16.mxu1 %v3384_v61  ;;  %v3497_v61 = vld [vmem:[%s4934_s3 + $0x548] ss:$16 sps:$4 sm:$0xff]  }
 0x1d8   :  { %2221 = vmatpush1.bf16.msra.mxu1 %v3382_v63  ;;  %v3502_v63 = vld [vmem:[%s4934_s3 + $0x684] ss:$16 sps:$4 sm:$0xff]  }
 0x1d9   :  { %2222 = vmatprep.subr.bf16.mxu1 %v3390_v0  ;;  %v3505_v0 = vld [vmem:[%s4934_s3 + $0x56c] ss:$16 sps:$4 sm:$0xff]  }
 0x1dc   :  { %2223 = vmatpush1.bf16.msra.mxu1 %v3388_v1  ;;  %v3500_v1 = vld [vmem:[%s4934_s3 + $0x680] ss:$16 sps:$4 sm:$0xff]  }
 0x1dd   :  { %2224 = vmatprep.subr.bf16.mxu1 %v3396_v2  ;;  %v3503_v2 = vld [vmem:[%s4934_s3 + $0x568] ss:$16 sps:$4 sm:$0xff]  }
 0x1e0   :  { %2225 = vmatpush1.bf16.msra.mxu1 %v3394_v4  ;;  %v3508_v4 = vld [vmem:[%s4934_s3 + $0x6a4] ss:$16 sps:$4 sm:$0xff]  }
 0x1e1   :  { %2226 = vmatprep.subr.bf16.mxu1 %v3402_v6  ;;  %v3511_v6 = vld [vmem:[%s4934_s3 + $0x58c] ss:$16 sps:$4 sm:$0xff]  }
 0x1e4   :  { %2227 = vmatpush1.bf16.msra.mxu1 %v3400_v7  ;;  %v3506_v7 = vld [vmem:[%s4934_s3 + $0x6a0] ss:$16 sps:$4 sm:$0xff]  }
 0x1e5   :  { %2228 = vmatprep.subr.bf16.mxu1 %v3408_v8  ;;  %v3509_v8 = vld [vmem:[%s4934_s3 + $0x588] ss:$16 sps:$4 sm:$0xff]  }
 0x1e8   :  { %2229 = vmatpush1.bf16.msra.mxu1 %v3406_v9  ;;  %v3514_v9 = vld [vmem:[%s4934_s3 + $0x6c4] ss:$16 sps:$4 sm:$0xff]  }
 0x1e9   :  { %2230 = vmatprep.subr.bf16.mxu1 %v3414_v10  ;;  %v3517_v10 = vld [vmem:[%s4934_s3 + $0x5ac] ss:$16 sps:$4 sm:$0xff]  }
 0x1ec   :  { %2231 = vmatpush1.bf16.msra.mxu1 %v3412_v11  ;;  %v3512_v11 = vld [vmem:[%s4934_s3 + $0x6c0] ss:$16 sps:$4 sm:$0xff]  }
 0x1ed   :  { %2232 = vmatprep.subr.bf16.mxu1 %v3420_v13  ;;  %v3515_v13 = vld [vmem:[%s4934_s3 + $0x5a8] ss:$16 sps:$4 sm:$0xff]  }
 0x1f0   :  { %2233 = vmatpush1.bf16.msra.mxu1 %v3418_v14  ;;  %v3520_v14 = vld [vmem:[%s4934_s3 + $0x6e4] ss:$16 sps:$4 sm:$0xff]  }
 0x1f1   :  { %2234 = vmatprep.subr.bf16.mxu1 %v3426_v15  ;;  %v3523_v15 = vld [vmem:[%s4934_s3 + $0x5cc] ss:$16 sps:$4 sm:$0xff]  }
 0x1f4   :  { %2235 = vmatpush1.bf16.msra.mxu1 %v3424_v18  ;;  %v3518_v18 = vld [vmem:[%s4934_s3 + $0x6e0] ss:$16 sps:$4 sm:$0xff]  }
 0x1f5   :  { %2236 = vmatprep.subr.bf16.mxu1 %v3432_v19  ;;  %v3521_v19 = vld [vmem:[%s4934_s3 + $0x5c8] ss:$16 sps:$4 sm:$0xff]  }
 0x1f8   :  { %2237 = vmatpush1.bf16.msra.mxu1 %v3430_v20  ;;  %v3526_v20 = vld [vmem:[%s4934_s3 + $0x704] ss:$16 sps:$4 sm:$0xff]  }
 0x1f9   :  { %v366_v25 = vpop.permute.xlu0 %365  ;;  %2247 = vmatprep.subr.bf16.mxu1 %v3438_v23  ;;  %v3529_v23 = vld [vmem:[%s4934_s3 + $0x5ec] ss:$16 sps:$4 sm:$0xff]  }
 0x1fa   :  { %368 = vst.msk [vmem:[#allocation2 + $0x9] sm:$0x1] %vm241_vm2, %v366_v25  ;;  %v3527_v25 = vld [vmem:[%s4934_s3 + $0x5e8] ss:$16 sps:$4 sm:$0xff]  }
 0x1fb   :  { %370 = vst.msk [vmem:[#allocation2 + $0x9] sm:$0x1] %vm256_vm3, %v4135_v59  ;;  %2239 = vmatmul.mubr.bf16.vlgmr.msra.gmra.mrb[8].mxu1 %v4065_v21  ;;  %v372_v27 = vpop.permute.xlu1 %371  ;;  %v3448_v59 = vld [vmem:[%s4934_s3 + $0x448] ss:$16 sps:$4 sm:$0xff]  }
 0x1fc   :  { %374 = vst.msk [vmem:[#allocation2 + $0xb] sm:$0x1] %vm241_vm2, %v372_v27  ;;  %2248 = vmatpush1.bf16.msra.mxu1 %v3436_v24  ;;  %v3524_v24 = vld [vmem:[%s4934_s3 + $0x700] ss:$16 sps:$4 sm:$0xff]   ;;  %v3535_v27 = vld [vmem:[%s4934_s3 + $0x60c] ss:$16 sps:$4 sm:$0xff]  }
 0x1fd   :  { %376 = vst.msk [vmem:[#allocation2 + $0xb] sm:$0x1] %vm256_vm3, %v4142_v62  ;;  %v378_v29 = vpop.permute.xlu0 %377  ;;  %2249 = vmatprep.subr.bf16.mxu1 %v3444_v26  ;;  %v3532_v26 = vld [vmem:[%s4934_s3 + $0x724] ss:$16 sps:$4 sm:$0xff]  }
 0x1fe   :  { %380 = vst.msk [vmem:[#allocation2 + $0xd] sm:$0x1] %vm241_vm2, %v378_v29  ;;  %v3533_v29 = vld [vmem:[%s4934_s3 + $0x608] ss:$16 sps:$4 sm:$0xff]  }
 0x1ff   :  { %382 = vst.msk [vmem:[#allocation2 + $0xd] sm:$0x1] %vm256_vm3, %v4155_v3  ;;  %v384_v21 = vpop.permute.xlu1 %383 }
 0x200   :  { %386 = vst.msk [vmem:[#allocation2 + $0xf] sm:$0x1] %vm241_vm2, %v384_v21  ;;  %2250 = vmatpush1.bf16.msra.mxu1 %v3442_v28  ;;  %v3530_v28 = vld [vmem:[%s4934_s3 + $0x720] ss:$16 sps:$4 sm:$0xff]   ;;  %v3541_v21 = vld [vmem:[%s4934_s3 + $0x62c] ss:$16 sps:$4 sm:$0xff]  }
 0x201   :  { %388 = vst.msk [vmem:[#allocation2 + $0xf] sm:$0x1] %vm256_vm3, %v4162_v5  ;;  %v304_v62 = vpop.permute.xlu0 %303  ;;  %2251 = vmatprep.subr.bf16.mxu1 %v3450_v30  ;;  %v3462_v5 = vld [vmem:[%s4934_s3 + $0x48c] ss:$16 sps:$4 sm:$0xff]   ;;  %v3538_v30 = vld [vmem:[%s4934_s3 + $0x744] ss:$16 sps:$4 sm:$0xff]  }
 0x202   :  { %306 = vst.msk [vmem:[#allocation2 + $0x8] sm:$0x1] %vm256_vm3, %v304_v62  ;;  %v3539_v62 = vld [vmem:[%s4934_s3 + $0x628] ss:$16 sps:$4 sm:$0xff]  }
 0x203   :  { %v313_v3 = vpop.permute.xlu1 %312 }
 0x204   :  { %315 = vst.msk [vmem:[#allocation2 + $0xa] sm:$0x1] %vm256_vm3, %v313_v3  ;;  %2252 = vmatpush1.bf16.msra.mxu1 %v3448_v59  ;;  %v3536_v59 = vld [vmem:[%s4934_s3 + $0x740] ss:$16 sps:$4 sm:$0xff]   ;;  %v3547_v3 = vld [vmem:[%s4934_s3 + $0x64c] ss:$16 sps:$4 sm:$0xff]  }
 0x205   :  { %v329_v33 = vpop.permute.xlu0 %328  ;;  %2253 = vmatprep.subr.bf16.mxu1 %v3456_v31  ;;  %v3544_v31 = vld [vmem:[%s4934_s3 + $0x764] ss:$16 sps:$4 sm:$0xff]  }
 0x206   :  { %331 = vst.msk [vmem:[#allocation2 + $0xc] sm:$0x1] %vm256_vm3, %v329_v33  ;;  %v3545_v33 = vld [vmem:[%s4934_s3 + $0x648] ss:$16 sps:$4 sm:$0xff]  }
 0x207   :  { %v338_v34 = vpop.permute.xlu1 %337 }
 0x208   :  { %340 = vst.msk [vmem:[#allocation2 + $0xe] sm:$0x1] %vm256_vm3, %v338_v34  ;;  %2254 = vmatpush1.bf16.msra.mxu1 %v3454_v32  ;;  %v3542_v32 = vld [vmem:[%s4934_s3 + $0x760] ss:$16 sps:$4 sm:$0xff]   ;;  %v3553_v34 = vld [vmem:[%s4934_s3 + $0x66c] ss:$16 sps:$4 sm:$0xff]  }
 0x209   :  { %2255 = vmatprep.subr.bf16.mxu1 %v3462_v5  ;;  %v3550_v5 = vld [vmem:[%s4934_s3 + $0x784] ss:$16 sps:$4 sm:$0xff]  }
 0x20c   :  { %2256 = vmatpush1.bf16.msra.mxu1 %v3460_v35  ;;  %v3548_v35 = vld [vmem:[%s4934_s3 + $0x780] ss:$16 sps:$4 sm:$0xff]  }
 0x20d   :  { %2257 = vmatprep.subr.bf16.mxu1 %v3468_v36  ;;  %v3551_v36 = vld [vmem:[%s4934_s3 + $0x668] ss:$16 sps:$4 sm:$0xff]  }
 0x20f   :  { %v390_v39 = vld [vmem:[#allocation2 + $0x8] sm:$0xff] }
 0x210   :  { %2258 = vmatpush1.bf16.msra.mxu1 %v3466_v37  ;;  %v417_v41 = vrot.slane %v390_v39, %v3951_v22  ;;  %v410_v42 = vcombine.high %v390_v39, %v390_v39  ;;  %v3556_v37 = vld [vmem:[%s4934_s3 + $0x7a4] ss:$16 sps:$4 sm:$0xff]   ;;  %v3554_v39 = vld [vmem:[%s4934_s3 + $0x7a0] ss:$16 sps:$4 sm:$0xff]  }
 0x211   :  { %2259 = vmatprep.subr.bf16.mxu1 %v3474_v38  ;;  %v3559_v38 = vld [vmem:[%s4934_s3 + $0x68c] ss:$16 sps:$4 sm:$0xff]  }
 0x212   :  { %v425_v44 = vcombine.high %v417_v41, %v417_v41  ;;  %v4439_v45 = vrot.slane %v410_v42, %v3951_v22  ;;  %v4449_v50 = vpack.c.bf16 %v417_v41, %v417_v41  ;;  %v3484_v22 = vld [vmem:[%s4934_s3 + $0x624] ss:$16 sps:$4 sm:$0xff]   ;;  %v3565_v42 = vld [vmem:[%s4934_s3 + $0x6ac] ss:$16 sps:$4 sm:$0xff]  }
 0x213   :  { %v3562_v41 = vld [vmem:[%s4934_s3 + $0x7c4] ss:$16 sps:$4 sm:$0xff]  }
 0x214   :  { %2260 = vmatpush1.bf16.msra.mxu1 %v3472_v40  ;;  %v440_v46 = vpack.c.bf16 %v425_v44, %v425_v44  ;;  %v426_v49 = vcombine.high %v4439_v45, %v4439_v45  ;;  %v3557_v40 = vld [vmem:[%s4934_s3 + $0x688] ss:$16 sps:$4 sm:$0xff]  }
 0x215   :  { %2261 = vmatprep.subr.bf16.mxu1 %v3480_v43  ;;  %v3560_v43 = vld [vmem:[%s4934_s3 + $0x7c0] ss:$16 sps:$4 sm:$0xff]   ;;  %v3563_v44 = vld [vmem:[%s4934_s3 + $0x6a8] ss:$16 sps:$4 sm:$0xff]  }
 0x216   :  { %2115 = vmatprep.mubr.bf16.mxu0 %v440_v46  ;;  %2279 = vmatprep.mubr.bf16.mxu1 %v440_v46  ;;  %v4454_v51 = vpack.c.bf16 %v426_v49, %v426_v49  ;;  %v3568_v46 = vld [vmem:[%s4934_s3 + $0x7e4] ss:$16 sps:$4 sm:$0xff]  }
 0x217   :  { %2116 = vmatmul.mubr.bf16.vlgmr.msra.gmra.mrb[4].mxu0 %v4449_v50 }
 0x218   :  { %2125 = vmatpush1.bf16.msra.mxu0 %v3475_v47  ;;  %2262 = vmatpush1.bf16.msra.mxu1 %v3478_v48  ;;  %v3571_v47 = vld [vmem:[%s4934_s3 + $0x6cc] ss:$16 sps:$4 sm:$0xff]  }
 0x219   :  { %2156 = vmatprep.mubr.bf16.mxu0 %v4454_v51  ;;  %2126 = vmatprep.subr.bf16.mxu0 %v3484_v22  ;;  %v3566_v22 = vld [vmem:[%s4934_s3 + $0x7e0] ss:$16 sps:$4 sm:$0xff]  }
 0x21a   :  { %2263 = vmatprep.subr.bf16.mxu1 %v3487_v52 }
 0x21c   :  { %2127 = vmatpush1.bf16.msra.mxu0 %v3482_v53  ;;  %2264 = vmatpush1.bf16.msra.mxu1 %v3485_v16  ;;  %v3574_v53 = vld [vmem:[%s4934_s3 + $0x6ec] ss:$16 sps:$4 sm:$0xff]  }
 0x21d   :  { %2128 = vmatprep.subr.bf16.mxu0 %v3490_v17  ;;  %2265 = vmatprep.subr.bf16.mxu1 %v3493_v54  ;;  %v3601_v16 = vld [vmem:[%s4936_s5 + $0x4] ss:$8 sps:$4 sm:$0xff]   ;;  %v3572_v17 = vld [vmem:[%s4934_s3 + $0x6e8] ss:$16 sps:$4 sm:$0xff]  }
 0x21e   :  { %v3599_v54 = vld [vmem:[%s4936_s5] ss:$8 sps:$4 sm:$0xff]  }
 0x220   :  { %2129 = vmatpush1.bf16.msra.mxu0 %v3488_v55  ;;  %2266 = vmatpush1.bf16.msra.mxu1 %v3491_v56  ;;  %v4655_v55 = vpack.c.bf16 %v4439_v45, %v4439_v45  ;;  %v3577_v56 = vld [vmem:[%s4934_s3 + $0x70c] ss:$16 sps:$4 sm:$0xff]   ;;  %v3602_v45 = vld [vmem:[%s4936_s5 + $0x10] ss:$8 sps:$4 sm:$0xff]  }
 0x221   :  { %2130 = vmatprep.subr.bf16.mxu0 %v3496_v57  ;;  %2267 = vmatprep.subr.bf16.mxu1 %v3499_v58  ;;  %v3604_v57 = vld [vmem:[%s4936_s5 + $0x14] ss:$8 sps:$4 sm:$0xff]   ;;  %v3575_v58 = vld [vmem:[%s4934_s3 + $0x708] ss:$16 sps:$4 sm:$0xff]  }
 0x224   :  { %2131 = vmatpush1.bf16.msra.mxu0 %v3494_v60  ;;  %2268 = vmatpush1.bf16.msra.mxu1 %v3497_v61  ;;  %v3580_v60 = vld [vmem:[%s4934_s3 + $0x72c] ss:$16 sps:$4 sm:$0xff]  }
 0x225   :  { %2132 = vmatprep.subr.bf16.mxu0 %v3502_v63  ;;  %2269 = vmatprep.subr.bf16.mxu1 %v3505_v0  ;;  %v3607_v61 = vld [vmem:[%s4936_s5 + $0x24] ss:$8 sps:$4 sm:$0xff]   ;;  %v3578_v63 = vld [vmem:[%s4934_s3 + $0x728] ss:$16 sps:$4 sm:$0xff]  }
 0x226   :  { %v3605_v0 = vld [vmem:[%s4936_s5 + $0x20] ss:$8 sps:$4 sm:$0xff]  }
 0x228   :  { %2133 = vmatpush1.bf16.msra.mxu0 %v3500_v1  ;;  %2270 = vmatpush1.bf16.msra.mxu1 %v3503_v2  ;;  %v3583_v1 = vld [vmem:[%s4934_s3 + $0x74c] ss:$16 sps:$4 sm:$0xff]  }
 0x229   :  { %2134 = vmatprep.subr.bf16.mxu0 %v3508_v4  ;;  %2271 = vmatprep.subr.bf16.mxu1 %v3511_v6  ;;  %v3610_v2 = vld [vmem:[%s4936_s5 + $0x34] ss:$8 sps:$4 sm:$0xff]   ;;  %v3581_v4 = vld [vmem:[%s4934_s3 + $0x748] ss:$16 sps:$4 sm:$0xff]  }
 0x22a   :  { %v3608_v6 = vld [vmem:[%s4936_s5 + $0x30] ss:$8 sps:$4 sm:$0xff]  }
 0x22c   :  { %2135 = vmatpush1.bf16.msra.mxu0 %v3506_v7  ;;  %2272 = vmatpush1.bf16.msra.mxu1 %v3509_v8  ;;  %v3586_v7 = vld [vmem:[%s4934_s3 + $0x76c] ss:$16 sps:$4 sm:$0xff]  }
 0x22d   :  { %2136 = vmatprep.subr.bf16.mxu0 %v3514_v9  ;;  %2273 = vmatprep.subr.bf16.mxu1 %v3517_v10  ;;  %v3613_v8 = vld [vmem:[%s4936_s5 + $0x44] ss:$8 sps:$4 sm:$0xff]   ;;  %v3584_v9 = vld [vmem:[%s4934_s3 + $0x768] ss:$16 sps:$4 sm:$0xff]  }
 0x22e   :  { %v3611_v10 = vld [vmem:[%s4936_s5 + $0x40] ss:$8 sps:$4 sm:$0xff]  }
 0x230   :  { %2137 = vmatpush1.bf16.msra.mxu0 %v3512_v11  ;;  %2274 = vmatpush1.bf16.msra.mxu1 %v3515_v13  ;;  %v3589_v11 = vld [vmem:[%s4934_s3 + $0x78c] ss:$16 sps:$4 sm:$0xff]  }
 0x231   :  { %2138 = vmatprep.subr.bf16.mxu0 %v3520_v14  ;;  %2275 = vmatprep.subr.bf16.mxu1 %v3523_v15  ;;  %v3616_v13 = vld [vmem:[%s4936_s5 + $0x54] ss:$8 sps:$4 sm:$0xff]   ;;  %v3587_v14 = vld [vmem:[%s4934_s3 + $0x788] ss:$16 sps:$4 sm:$0xff]  }
 0x232   :  { %v3614_v15 = vld [vmem:[%s4936_s5 + $0x50] ss:$8 sps:$4 sm:$0xff]  }
 0x234   :  { %2139 = vmatpush1.bf16.msra.mxu0 %v3518_v18  ;;  %2276 = vmatpush1.bf16.msra.mxu1 %v3521_v19  ;;  %v3592_v18 = vld [vmem:[%s4934_s3 + $0x7ac] ss:$16 sps:$4 sm:$0xff]  }
 0x235   :  { %2140 = vmatprep.subr.bf16.mxu0 %v3526_v20  ;;  %2277 = vmatprep.subr.bf16.mxu1 %v3529_v23  ;;  %v3619_v19 = vld [vmem:[%s4936_s5 + $0x64] ss:$8 sps:$4 sm:$0xff]   ;;  %v3590_v20 = vld [vmem:[%s4934_s3 + $0x7a8] ss:$16 sps:$4 sm:$0xff]  }
 0x236   :  { %v3617_v23 = vld [vmem:[%s4936_s5 + $0x60] ss:$8 sps:$4 sm:$0xff]  }
 0x238   :  { %2141 = vmatpush1.bf16.msra.mxu0 %v3524_v24  ;;  %2278 = vmatpush1.bf16.msra.mxu1 %v3527_v25  ;;  %v3595_v24 = vld [vmem:[%s4934_s3 + $0x7cc] ss:$16 sps:$4 sm:$0xff]  }
 0x239   :  { %2142 = vmatprep.subr.bf16.mxu0 %v3532_v26  ;;  %2288 = vmatprep.subr.bf16.mxu1 %v3535_v27  ;;  %v3622_v25 = vld [vmem:[%s4936_s5 + $0x74] ss:$8 sps:$4 sm:$0xff]   ;;  %v3593_v26 = vld [vmem:[%s4934_s3 + $0x7c8] ss:$16 sps:$4 sm:$0xff]  }
 0x23a   :  { %v3620_v27 = vld [vmem:[%s4936_s5 + $0x70] ss:$8 sps:$4 sm:$0xff]  }
 0x23b   :  { %2280 = vmatmul.mubr.bf16.vlgmr.msra.gmra.mrb[8].mxu1 %v4449_v50 }
 0x23c   :  { %2143 = vmatpush1.bf16.msra.mxu0 %v3530_v28  ;;  %2289 = vmatpush1.bf16.msra.mxu1 %v3533_v29  ;;  %v3598_v28 = vld [vmem:[%s4934_s3 + $0x7ec] ss:$16 sps:$4 sm:$0xff]  }
 0x23d   :  { %2320 = vmatprep.mubr.bf16.mxu1 %v4454_v51  ;;  %2144 = vmatprep.subr.bf16.mxu0 %v3538_v30  ;;  %v3569_v51 = vld [vmem:[%s4934_s3 + $0x6c8] ss:$16 sps:$4 sm:$0xff]   ;;  %v3625_v29 = vld [vmem:[%s4936_s5 + $0x84] ss:$8 sps:$4 sm:$0xff]  }
 0x23e   :  { %2290 = vmatprep.subr.bf16.mxu1 %v3541_v21  ;;  %v3596_v30 = vld [vmem:[%s4934_s3 + $0x7e8] ss:$16 sps:$4 sm:$0xff]  }
 0x23f   :  { %v3623_v21 = vld [vmem:[%s4936_s5 + $0x80] ss:$8 sps:$4 sm:$0xff]  }
 0x240   :  { %2145 = vmatpush1.bf16.msra.mxu0 %v3536_v59  ;;  %2291 = vmatpush1.bf16.msra.mxu1 %v3539_v62  ;;  %v3628_v59 = vld [vmem:[%s4936_s5 + $0x94] ss:$8 sps:$4 sm:$0xff]   ;;  %v3626_v62 = vld [vmem:[%s4936_s5 + $0x90] ss:$8 sps:$4 sm:$0xff]  }
 0x241   :  { %2146 = vmatprep.subr.bf16.mxu0 %v3544_v31  ;;  %2292 = vmatprep.subr.bf16.mxu1 %v3547_v3  ;;  %v3631_v31 = vld [vmem:[%s4936_s5 + $0xa4] ss:$8 sps:$4 sm:$0xff]   ;;  %v3629_v3 = vld [vmem:[%s4936_s5 + $0xa0] ss:$8 sps:$4 sm:$0xff]  }
 0x244   :  { %2147 = vmatpush1.bf16.msra.mxu0 %v3542_v32  ;;  %2293 = vmatpush1.bf16.msra.mxu1 %v3545_v33  ;;  %v3634_v32 = vld [vmem:[%s4936_s5 + $0xb4] ss:$8 sps:$4 sm:$0xff]   ;;  %v3632_v33 = vld [vmem:[%s4936_s5 + $0xb0] ss:$8 sps:$4 sm:$0xff]  }
 0x245   :  { %2148 = vmatprep.subr.bf16.mxu0 %v3550_v5  ;;  %2294 = vmatprep.subr.bf16.mxu1 %v3553_v34  ;;  %v3637_v5 = vld [vmem:[%s4936_s5 + $0xc4] ss:$8 sps:$4 sm:$0xff]   ;;  %v3635_v34 = vld [vmem:[%s4936_s5 + $0xc0] ss:$8 sps:$4 sm:$0xff]  }
 0x248   :  { %2149 = vmatpush1.bf16.msra.mxu0 %v3548_v35  ;;  %2295 = vmatpush1.bf16.msra.mxu1 %v3551_v36  ;;  %v3640_v35 = vld [vmem:[%s4936_s5 + $0xd4] ss:$8 sps:$4 sm:$0xff]   ;;  %v3638_v36 = vld [vmem:[%s4936_s5 + $0xd0] ss:$8 sps:$4 sm:$0xff]  }
 0x249   :  { %2150 = vmatprep.subr.bf16.mxu0 %v3556_v37  ;;  %2296 = vmatprep.subr.bf16.mxu1 %v3559_v38  ;;  %v3643_v37 = vld [vmem:[%s4936_s5 + $0xe4] ss:$8 sps:$4 sm:$0xff]   ;;  %v3641_v38 = vld [vmem:[%s4936_s5 + $0xe0] ss:$8 sps:$4 sm:$0xff]  }
 0x24c   :  { %2151 = vmatpush1.bf16.msra.mxu0 %v3554_v39  ;;  %2297 = vmatpush1.bf16.msra.mxu1 %v3557_v40  ;;  %v3646_v39 = vld [vmem:[%s4936_s5 + $0xf4] ss:$8 sps:$4 sm:$0xff]   ;;  %v3644_v40 = vld [vmem:[%s4936_s5 + $0xf0] ss:$8 sps:$4 sm:$0xff]  }
 0x24d   :  { %2152 = vmatprep.subr.bf16.mxu0 %v3562_v41  ;;  %2298 = vmatprep.subr.bf16.mxu1 %v3565_v42  ;;  %v3649_v41 = vld [vmem:[%s4936_s5 + $0x104] ss:$8 sps:$4 sm:$0xff]   ;;  %v703_v42 = vsub.s32 0, %v3936_v12 }
 0x24e   :  { %v4631_v48 = vpop.f32.mrb[4].mxu1 }
 0x24f   :  { %v4633_v49 = vpop.f32.mrb[5].mxu1 }
 0x250   :  { %2153 = vmatpush1.bf16.msra.mxu0 %v3560_v43  ;;  %2299 = vmatpush1.bf16.msra.mxu1 %v3563_v44  ;;  %v2039_v50 = vpop.f32.mrb[6].mxu1  ;;  %v4804_v43 = vld [vmem:[%s4935_s4] sm:$0xf]  ;;  %v707_v44 = vsub.s32 1, %v3936_v12 }
 0x251   :  { %v2040_v52 = vpop.f32.mrb[7].mxu1  ;;  %2154 = vmatprep.subr.bf16.mxu0 %v3568_v46  ;;  %2300 = vmatprep.subr.bf16.mxu1 %v3571_v47  ;;  %v704_v46 = vrot.slane %v4804_v43, %v703_v42 }
 0x252   :  { %v708_v47 = vrot.slane %v4804_v43, %v707_v44 }
 0x253   :  { %v2036_v50 = vadd.f32 %v4631_v48, %v704_v46  ;;  %v3650_v48 = vld [vmem:[%s4936_s5 + $0x110] ss:$8 sps:$4 sm:$0xff]  }
 0x254   :  { %2155 = vmatpush1.bf16.msra.mxu0 %v3566_v22  ;;  %2301 = vmatpush1.bf16.msra.mxu1 %v3569_v51  ;;  %v2038_v22 = vadd.f32 %v4633_v49, %v708_v47  ;;  %v3655_v49 = vld [vmem:[%s4936_s5 + $0x124] ss:$8 sps:$4 sm:$0xff]  }
 0x255   :  { %2302 = vmatprep.subr.bf16.mxu1 %v3574_v53  ;;  %2729 = vmatprep.subr.bf16.mxu0 %v3601_v16 }
 0x257   :  { %2157 = vmatmul.mubr.bf16.vlgmr.msra.gmra.mrb[4].mxu0 %v4655_v55 }
 0x258   :  { %2303 = vmatpush1.bf16.msra.mxu1 %v3572_v17  ;;  %2730 = vmatpush1.bf16.msra.mxu0 %v3599_v54 }
 0x259   :  { %2304 = vmatprep.subr.bf16.mxu1 %v3577_v56  ;;  %2731 = vmatprep.subr.bf16.mxu0 %v3604_v57  ;;  %v3647_v56 = vld [vmem:[%s4936_s5 + $0x100] ss:$8 sps:$4 sm:$0xff]  }
 0x25c   :  { %2305 = vmatpush1.bf16.msra.mxu1 %v3575_v58  ;;  %2732 = vmatpush1.bf16.msra.mxu0 %v3602_v45  ;;  %v3652_v58 = vld [vmem:[%s4936_s5 + $0x114] ss:$8 sps:$4 sm:$0xff]   ;;  %v3653_v45 = vld [vmem:[%s4936_s5 + $0x120] ss:$8 sps:$4 sm:$0xff]  }
 0x25d   :  { %2306 = vmatprep.subr.bf16.mxu1 %v3580_v60  ;;  %2733 = vmatprep.subr.bf16.mxu0 %v3607_v61  ;;  %v3658_v60 = vld [vmem:[%s4936_s5 + $0x134] ss:$8 sps:$4 sm:$0xff]   ;;  %v3656_v61 = vld [vmem:[%s4936_s5 + $0x130] ss:$8 sps:$4 sm:$0xff]  }
 0x260   :  { %2307 = vmatpush1.bf16.msra.mxu1 %v3578_v63  ;;  %2734 = vmatpush1.bf16.msra.mxu0 %v3605_v0  ;;  %v3661_v63 = vld [vmem:[%s4936_s5 + $0x144] ss:$8 sps:$4 sm:$0xff]   ;;  %v3659_v0 = vld [vmem:[%s4936_s5 + $0x140] ss:$8 sps:$4 sm:$0xff]  }
 0x261   :  { %2308 = vmatprep.subr.bf16.mxu1 %v3583_v1  ;;  %2735 = vmatprep.subr.bf16.mxu0 %v3610_v2  ;;  %v3664_v1 = vld [vmem:[%s4936_s5 + $0x154] ss:$8 sps:$4 sm:$0xff]   ;;  %v3662_v2 = vld [vmem:[%s4936_s5 + $0x150] ss:$8 sps:$4 sm:$0xff]  }
 0x264   :  { %2309 = vmatpush1.bf16.msra.mxu1 %v3581_v4  ;;  %2736 = vmatpush1.bf16.msra.mxu0 %v3608_v6  ;;  %v3667_v4 = vld [vmem:[%s4936_s5 + $0x164] ss:$8 sps:$4 sm:$0xff]   ;;  %v3665_v6 = vld [vmem:[%s4936_s5 + $0x160] ss:$8 sps:$4 sm:$0xff]  }
 0x265   :  { %2310 = vmatprep.subr.bf16.mxu1 %v3586_v7  ;;  %2737 = vmatprep.subr.bf16.mxu0 %v3613_v8  ;;  %v3670_v7 = vld [vmem:[%s4936_s5 + $0x174] ss:$8 sps:$4 sm:$0xff]   ;;  %v715_v8 = vsub.s32 3, %v3936_v12 }
 0x268   :  { %2311 = vmatpush1.bf16.msra.mxu1 %v3584_v9  ;;  %2738 = vmatpush1.bf16.msra.mxu0 %v3611_v10  ;;  %v3668_v9 = vld [vmem:[%s4936_s5 + $0x170] ss:$8 sps:$4 sm:$0xff]   ;;  %v3673_v10 = vld [vmem:[%s4936_s5 + $0x184] ss:$8 sps:$4 sm:$0xff]  }
 0x269   :  { %2312 = vmatprep.subr.bf16.mxu1 %v3589_v11  ;;  %2739 = vmatprep.subr.bf16.mxu0 %v3616_v13  ;;  %v716_v11 = vrot.slane %v4804_v43, %v715_v8 }
 0x26c   :  { %2313 = vmatpush1.bf16.msra.mxu1 %v3587_v14  ;;  %2740 = vmatpush1.bf16.msra.mxu0 %v3614_v15  ;;  %v3671_v14 = vld [vmem:[%s4936_s5 + $0x180] ss:$8 sps:$4 sm:$0xff]  }
 0x26d   :  { %2314 = vmatprep.subr.bf16.mxu1 %v3592_v18  ;;  %2741 = vmatprep.subr.bf16.mxu0 %v3619_v19  ;;  %v3676_v18 = vld [vmem:[%s4936_s5 + $0x194] ss:$8 sps:$4 sm:$0xff]  }
 0x270   :  { %2315 = vmatpush1.bf16.msra.mxu1 %v3590_v20  ;;  %2742 = vmatpush1.bf16.msra.mxu0 %v3617_v23 }
 0x271   :  { %2316 = vmatprep.subr.bf16.mxu1 %v3595_v24  ;;  %2743 = vmatprep.subr.bf16.mxu0 %v3622_v25  ;;  %v3674_v25 = vld [vmem:[%s4936_s5 + $0x190] ss:$8 sps:$4 sm:$0xff]  }
 0x274   :  { %2317 = vmatpush1.bf16.msra.mxu1 %v3593_v26  ;;  %2744 = vmatpush1.bf16.msra.mxu0 %v3620_v27  ;;  %v3679_v26 = vld [vmem:[%s4936_s5 + $0x1a4] ss:$8 sps:$4 sm:$0xff]   ;;  %v3677_v27 = vld [vmem:[%s4936_s5 + $0x1a0] ss:$8 sps:$4 sm:$0xff]  }
 0x275   :  { %2318 = vmatprep.subr.bf16.mxu1 %v3598_v28  ;;  %2745 = vmatprep.subr.bf16.mxu0 %v3625_v29  ;;  %v3682_v28 = vld [vmem:[%s4936_s5 + $0x1b4] ss:$8 sps:$4 sm:$0xff]   ;;  %v3680_v29 = vld [vmem:[%s4936_s5 + $0x1b0] ss:$8 sps:$4 sm:$0xff]  }
 0x278   :  { %2319 = vmatpush1.bf16.msra.mxu1 %v3596_v30  ;;  %2746 = vmatpush1.bf16.msra.mxu0 %v3623_v21  ;;  %v3685_v30 = vld [vmem:[%s4936_s5 + $0x1c4] ss:$8 sps:$4 sm:$0xff]   ;;  %v3683_v21 = vld [vmem:[%s4936_s5 + $0x1c0] ss:$8 sps:$4 sm:$0xff]  }
 0x279   :  { %2747 = vmatprep.subr.bf16.mxu0 %v3628_v59  ;;  %v3688_v59 = vld [vmem:[%s4936_s5 + $0x1d4] ss:$8 sps:$4 sm:$0xff]  }
 0x27b   :  { %2321 = vmatmul.mubr.bf16.vlgmr.msra.gmra.mrb[8].mxu1 %v4655_v55 }
 0x27c   :  { %2748 = vmatpush1.bf16.msra.mxu0 %v3626_v62  ;;  %v3686_v62 = vld [vmem:[%s4936_s5 + $0x1d0] ss:$8 sps:$4 sm:$0xff]  }
 0x27d   :  { %2749 = vmatprep.subr.bf16.mxu0 %v3631_v31  ;;  %v711_v31 = vsub.s32 2, %v3936_v12 }
 0x280   :  { %2750 = vmatpush1.bf16.msra.mxu0 %v3629_v3  ;;  %v3691_v3 = vld [vmem:[%s4936_s5 + $0x1e4] ss:$8 sps:$4 sm:$0xff]  }
 0x281   :  { %2751 = vmatprep.subr.bf16.mxu0 %v3634_v32  ;;  %v3689_v32 = vld [vmem:[%s4936_s5 + $0x1e0] ss:$8 sps:$4 sm:$0xff]  }
 0x284   :  { %2752 = vmatpush1.bf16.msra.mxu0 %v3632_v33  ;;  %v712_v33 = vrot.slane %v4804_v43, %v711_v31 }
 0x285   :  { %2753 = vmatprep.subr.bf16.mxu0 %v3637_v5  ;;  %v3694_v5 = vld [vmem:[%s4936_s5 + $0x1f4] ss:$8 sps:$4 sm:$0xff]  }
 0x288   :  { %2754 = vmatpush1.bf16.msra.mxu0 %v3635_v34  ;;  %v3692_v34 = vld [vmem:[%s4936_s5 + $0x1f0] ss:$8 sps:$4 sm:$0xff]   ;;  %s2829_s5 = sshll.u32 %s3723_s29, 4  ;;  %s2830_s5 = int_to_ptr.vmem [resolvable:$true] %s2829_s5 }
 0x289   :  { %2755 = vmatprep.subr.bf16.mxu0 %v3640_v35  ;;  %s3695_s30 = scalar_lea.vmem %s2830_s5, 64  ;;  %p3700_p1 = scmp.lt.s32.totalorder %s2830_s5, %s2830_s5 }
 0x28a   :  { %p3696_p0 = scmp.ne.s32.totalorder %s2830_s5, %s3695_s30  ;;  %p3701_p2 = scmp.lt.s32.totalorder %s3695_s30, %s3695_s30 }
 0x28c   :  { %2756 = vmatpush1.bf16.msra.mxu0 %v3638_v36  ;;  %p3702_p3 = por %p3701_p2, %p3700_p1 }
 0x28d   :  { %2757 = vmatprep.subr.bf16.mxu0 %v3643_v37  ;;  %v2397_v37 = vld [vmem:[%s4937_s6] sm:$0x3] }
 0x28e   :  { %p3703_p4 = pnand %p3702_p3, %p3696_p0 }
 0x290   :  { %2758 = vmatpush1.bf16.msra.mxu0 %v3641_v38  ;;  %v2402_v38 = vrot.slane %v2397_v37, %v703_v42 }
 0x291   :  { %2759 = vmatprep.subr.bf16.mxu0 %v3646_v39  ;;  %v2406_v39 = vrot.slane %v2397_v37, %v707_v44 }
 0x294   :  { %2760 = vmatpush1.bf16.msra.mxu0 %v3644_v40 }
 0x295   :  { %2770 = vmatprep.subr.bf16.mxu0 %v3649_v41 }
 0x32a   :  { %v2158_v51 = vpop.f32.mrb[4].mxu0 }
 0x32b   :  { %v3175_v52 = vadd.f32 %v2158_v51, %v2036_v50  ;;  %v2160_v53 = vpop.f32.mrb[5].mxu0 }
 0x32c   :  { %v3177_v16 = vadd.f32 %v2160_v53, %v2038_v22  ;;  %v2162_v17 = vpop.f32.mrb[6].mxu0 }
 0x32d   :  { %v2163_v54 = vpop.f32.mrb[7].mxu0  ;;  %v2329_v57 = vpack.c.bf16 %v3175_v52, %v3175_v52 }
 0x32e   :  { %v2330_v55 = vpack.c.bf16 %v3177_v16, %v3177_v16 }
 0x330   :  { %2761 = vmatprep.mubr.bf16.mxu0 %v2330_v55 }
 0x331   :  { %2762 = vmatmul.mubr.bf16.vlgmr.msra.gmra.mrb[8].mxu0 %v2329_v57 }
 0x332   :  { %2771 = vmatpush1.bf16.msra.mxu0 %v3647_v56 }
 0x333   :  { %2772 = vmatprep.subr.bf16.mxu0 %v3652_v58 }
 0x336   :  { %2773 = vmatpush1.bf16.msra.mxu0 %v3650_v48 }
 0x337   :  { %2774 = vmatprep.subr.bf16.mxu0 %v3655_v49 }
 0x33a   :  { %2775 = vmatpush1.bf16.msra.mxu0 %v3653_v45 }
 0x33b   :  { %2776 = vmatprep.subr.bf16.mxu0 %v3658_v60 }
 0x33e   :  { %2777 = vmatpush1.bf16.msra.mxu0 %v3656_v61 }
 0x33f   :  { %2778 = vmatprep.subr.bf16.mxu0 %v3661_v63 }
 0x342   :  { %2779 = vmatpush1.bf16.msra.mxu0 %v3659_v0 }
 0x343   :  { %2780 = vmatprep.subr.bf16.mxu0 %v3664_v1 }
 0x346   :  { %2781 = vmatpush1.bf16.msra.mxu0 %v3662_v2 }
 0x347   :  { %2782 = vmatprep.subr.bf16.mxu0 %v3667_v4 }
 0x34a   :  { %2783 = vmatpush1.bf16.msra.mxu0 %v3665_v6 }
 0x34b   :  { %2784 = vmatprep.subr.bf16.mxu0 %v3670_v7 }
 0x34e   :  { %2785 = vmatpush1.bf16.msra.mxu0 %v3668_v9  ;;  %v2322_v13 = vpop.f32.mrb[8].mxu1 }
 0x34f   :  { %v2324_v15 = vpop.f32.mrb[9].mxu1  ;;  %2786 = vmatprep.subr.bf16.mxu0 %v3673_v10  ;;  %v3178_v35 = vadd.f32 %v2322_v13, %v712_v33 }
 0x350   :  { %v3179_v19 = vadd.f32 %v2324_v15, %v716_v11  ;;  %v2326_v20 = vpop.f32.mrb[10].mxu1 }
 0x351   :  { %v2327_v23 = vpop.f32.mrb[11].mxu1  ;;  %v2331_v36 = vpack.c.bf16 %v3178_v35, %v3178_v35 }
 0x352   :  { %v2332_v24 = vpack.c.bf16 %v3179_v19, %v3179_v19  ;;  %2787 = vmatpush1.bf16.msra.mxu0 %v3671_v14 }
 0x353   :  { %2788 = vmatprep.subr.bf16.mxu0 %v3676_v18 }
 0x354   :  { %2802 = vmatprep.mubr.bf16.mxu0 %v2332_v24 }
 0x356   :  { %2789 = vmatpush1.bf16.msra.mxu0 %v3674_v25 }
 0x357   :  { %2790 = vmatprep.subr.bf16.mxu0 %v3679_v26 }
 0x35a   :  { %2791 = vmatpush1.bf16.msra.mxu0 %v3677_v27 }
 0x35b   :  { %2792 = vmatprep.subr.bf16.mxu0 %v3682_v28 }
 0x35e   :  { %2793 = vmatpush1.bf16.msra.mxu0 %v3680_v29 }
 0x35f   :  { %2794 = vmatprep.subr.bf16.mxu0 %v3685_v30 }
 0x362   :  { %2795 = vmatpush1.bf16.msra.mxu0 %v3683_v21 }
 0x363   :  { %2796 = vmatprep.subr.bf16.mxu0 %v3688_v59 }
 0x366   :  { %2797 = vmatpush1.bf16.msra.mxu0 %v3686_v62 }
 0x367   :  { %2798 = vmatprep.subr.bf16.mxu0 %v3691_v3 }
 0x36a   :  { %2799 = vmatpush1.bf16.msra.mxu0 %v3689_v32 }
 0x36b   :  { %2800 = vmatprep.subr.bf16.mxu0 %v3694_v5 }
 0x36e   :  { %2801 = vmatpush1.bf16.msra.mxu0 %v3692_v34 }
 0x371   :  { %2803 = vmatmul.mubr.bf16.vlgmr.msra.gmra.mrb[8].mxu0 %v2331_v36 }
 0x444   :  { %v2804_v40 = vpop.f32.mrb[8].mxu0 }
 0x445   :  { %v3180_v41 = vadd.f32 %v2804_v40, %v2402_v38  ;;  %v2806_v43 = vpop.f32.mrb[9].mxu0 }
 0x446   :  { %v3181_v46 = vadd.f32 %v2806_v43, %v2406_v39  ;;  %v2808_v47 = vpop.f32.mrb[10].mxu0 }
 0x447   :  { %v2809_v50 = vpop.f32.mrb[11].mxu0 }
 0x448   :  { %v2813_v22 = vcombine.low %v3180_v41, %v3181_v46 }
 0x44a   :  { %3165 = vst.sshfl [vmem:[#allocation3] sm:$0x33 pattern:$0x76325410] %v2813_v22 }
 0x44b   :  { %3706 = shalt.err (!%p3703_p4)
}
 0x44c   :  { %s3707_s0 = scalar_lea.hbm %s4938_s7, 64 }
 0x44d   :  { %p3708_p5 = scmp.ne.s32.totalorder %s4938_s7, %s3707_s0  ;;  %p3711_p6 = scmp.lt.u32.totalorder %s3707_s0, %s4938_s7 }
 0x44f   :  { %p3713_p7 = pnand %p3711_p6, %p3708_p5 }
 0x451   :  { %3716 = shalt.err (!%p3713_p7)
}
 0x452   :  { %2832 = dma.vmem_to_hbm [thread:$0]  %s2830_s5, 64, %s4938_s7, [#allocation4]  }
 0x453   :  { %3717 = dma.done.wait [#allocation4], 64  }
 0x454   :  { %3718 = vsyncadd [#allocation4], 4294967232 }
 0x455   :  { %2836 = vsyncpa [#allocation4], 1 }

</bundles_post_ra>
